<compile_context>
chip_gen: v7x
topology: tpu7x:2x2x1
jax: 0.10.0
libtpu: 0.0.40
codegen_flags: <defaults>
</compile_context>

<pallas_src>
import functools

import jax
import jax.numpy as jnp
from jax.experimental import pallas as pl
from jax.experimental.pallas import tpu as pltpu


# ----------------------------------------------------------------------------
# Kernel: one (batch, channel-tile) step handles BOTH token groups.
# ----------------------------------------------------------------------------
def _poscnn_kernel(x_ref, w_ref, b_ref, o_ref, *pad_refs, groups):
    # x_ref : (1, N, Ct)  input tokens (channels-last channel tile)
    # w_ref : (9, Ct)     3x3 depthwise taps, row-major over (dh, dw);
    #                     center tap already carries the +1 residual when s==1
    # b_ref : (1, Ct)     bias
    # o_ref : (1, N, Ct)  output tokens (final layout -> no concat afterwards)
    # pad_refs: one (H+2, W+2, Ct) f32 VMEM halo scratch per group
    # groups : static tuple of (H, W, token_offset)
    w = w_ref[...].astype(jnp.float32)      # (9, Ct)
    bias = b_ref[0].astype(jnp.float32)     # (Ct,)
    ct = w.shape[-1]

    for (H, W, off), pad_ref in zip(groups, pad_refs):
        # ---- zero the 1-px halo border (interior is fully overwritten below) --
        zrow = jnp.zeros((1, W + 2, ct), jnp.float32)
        pad_ref[0:1, :, :] = zrow
        pad_ref[H + 1:H + 2, :, :] = zrow
        zcol = jnp.zeros((H, 1, ct), jnp.float32)
        pad_ref[1:H + 1, 0:1, :] = zcol
        pad_ref[1:H + 1, W + 1:W + 2, :] = zcol

        # ---- interior: (H*W, Ct) tokens -> (H, W, Ct) map (row-major) --------
        # NOTE: with W a multiple of 8 this reshape is layout-trivial.
        xin = x_ref[0, off:off + H * W, :].astype(jnp.float32).reshape(H, W, ct)
        pad_ref[1:H + 1, 1:W + 1, :] = xin

        # ---- depthwise 3x3: 3 sublane-shifted plane loads (one per dw), then
        #      free major-axis (H) slices; 9 FMAs on the VPU.  acc starts from
        #      the first tap; bias added once at the end.
        acc = None
        for dw in range(3):
            plane = pad_ref[0:H + 2, dw:dw + W, :]          # (H+2, W, Ct)
            for dh in range(3):
                term = plane[dh:dh + H] * w[dh * 3 + dw]
                acc = term if acc is None else acc + term
        acc = acc + bias

        o_ref[0, off:off + H * W, :] = acc.reshape(H * W, ct).astype(o_ref.dtype)


# ----------------------------------------------------------------------------
# Full PosCNN forward: single fused pallas_call writing the final (B, N, C).
# ----------------------------------------------------------------------------
def pos_cnn(x, H_x, W_x, H_z, W_z, params, *, s=1):
    """x: (B, N, C) with N == H_z*W_z + H_x*W_x.  Returns (B, N', C)."""
    B, N, C = x.shape
    Nz, Nx = H_z * W_z, H_x * W_x
    assert N == Nz + Nx

    # 128-lane channel tiles when possible (lane-dense, bounded VMEM/vregs).
    Ct = 128 if C % 128 == 0 else C
    n_ct = C // Ct

    # Depthwise taps (3,3,C) -> (9,C); fold the s==1 residual into the center tap.
    w9 = params["w"].reshape(9, C).astype(jnp.float32)
    if s == 1:
        w9 = w9.at[4].add(1.0)
    b2 = params["b"].reshape(1, C).astype(jnp.float32)

    groups = ((H_z, W_z, 0), (H_x, W_x, Nz))
    kern = functools.partial(_poscnn_kernel, groups=groups)

    elem = jnp.dtype(x.dtype).itemsize
    cost = pl.CostEstimate(
        flops=int(2 * B * N * C * 9),
        transcendentals=0,
        bytes_accessed=int(2 * B * N * C * elem + (w9.size + b2.size) * 4),
    )

    out = pl.pallas_call(
        kern,
        out_shape=jax.ShapeDtypeStruct((B, N, C), x.dtype),
        grid_spec=pltpu.PrefetchScalarGridSpec(
            num_scalar_prefetch=0,
            grid=(B, n_ct),                                   # one image+C-tile per step
            in_specs=[
                pl.BlockSpec((1, N, Ct), lambda b, c: (b, 0, c)),   # tokens
                pl.BlockSpec((9, Ct), lambda b, c: (0, c)),         # taps (resident)
                pl.BlockSpec((1, Ct), lambda b, c: (0, c)),         # bias (resident)
            ],
            out_specs=pl.BlockSpec((1, N, Ct), lambda b, c: (b, 0, c)),
            scratch_shapes=[
                pltpu.VMEM((H_z + 2, W_z + 2, Ct), jnp.float32),    # z halo buffer
                pltpu.VMEM((H_x + 2, W_x + 2, Ct), jnp.float32),    # x halo buffer
            ],
        ),
        compiler_params=pltpu.CompilerParams(
            dimension_semantics=("parallel", "parallel")),          # megacore-friendly
        cost_estimate=cost,
    )(x, w9, b2)

    if s == 1:
        return out

    # s != 1: module adds no residual (center tap not folded above); a strided
    # conv(k=3, pad=1) equals the dense conv subsampled, so subsample per group.
    # TODO(synk): for s != 1, stride the H/W slices inside the kernel instead.
    z = out[:, :Nz, :].reshape(B, H_z, W_z, C)[:, ::s, ::s, :]
    xx = out[:, Nz:, :].reshape(B, H_x, W_x, C)[:, ::s, ::s, :]
    return jnp.concatenate([z.reshape(B, -1, C), xx.reshape(B, -1, C)], axis=1)


# ----------------------------------------------------------------------------
# Pure-JAX reference (lax depthwise conv) for the correctness check.
# ----------------------------------------------------------------------------
def pos_cnn_ref(x, H_x, W_x, H_z, W_z, params, *, s=1):
    B, N, C = x.shape
    Nz = H_z * W_z
    kernel = params["w"][:, :, None, :]          # (3, 3, 1, C) HWIO depthwise

    def conv(tok, H, W):
        m = tok.reshape(B, H, W, C)
        y = jax.lax.conv_general_dilated(
            m, kernel, window_strides=(s, s), padding=((1, 1), (1, 1)),
            dimension_numbers=("NHWC", "HWIO", "NHWC"),
            feature_group_count=C,
            precision=jax.lax.Precision.HIGHEST,
        ) + params["b"]
        if s == 1:
            y = y + m
        return y.reshape(B, -1, C)

    return jnp.concatenate(
        [conv(x[:, :Nz, :], H_z, W_z), conv(x[:, Nz:, :], H_x, W_x)], axis=1)


# ----------------------------------------------------------------------------
# main
# ----------------------------------------------------------------------------
if __name__ == "__main__":
    # Small shapes consistent with the module: lane-dense embed_dim=128,
    # search map 16x16, template map 8x8, batch 2, s=1 (module default).
    B, C = 2, 128
    H_x, W_x = 16, 16
    H_z, W_z = 8, 8
    s = 1
    N = H_z * W_z + H_x * W_x

    key = jax.random.PRNGKey(0)
    kx, kw, kb = jax.random.split(key, 3)
    x = jax.random.normal(kx, (B, N, C), dtype=jnp.float32)
    params = {
        "w": 0.1 * jax.random.normal(kw, (3, 3, C), dtype=jnp.float32),  # depthwise taps
        "b": 0.05 * jax.random.normal(kb, (C,), dtype=jnp.float32),      # bias
    }

    # TODO(synk): the original module wraps forward in mmcv's @auto_fp16();
    # that autocast policy is a training-framework concern and is not
    # replicated here (f32 I/O; bf16 I/O works through the same kernel since
    # accumulation is in f32).

    out = jax.block_until_ready(pos_cnn(x, H_x, W_x, H_z, W_z, params, s=s))
    ref = pos_cnn_ref(x, H_x, W_x, H_z, W_z, params, s=s)
    assert out.shape == (B, N, C)
    assert jnp.allclose(out, ref, atol=1e-4, rtol=1e-4), "mismatch vs reference"

    print("KERNEL_OK")
</pallas_src>

<mosaic_0001>
module attributes {stable_mosaic.version = 11 : i64} {
  func.func @_poscnn_kernel(%arg0: i32, %arg1: i32, %arg2: memref<1x320x128xf32, #tpu.memory_space<vmem>>, %arg3: memref<9x128xf32, #tpu.memory_space<vmem>>, %arg4: memref<1x128xf32, #tpu.memory_space<vmem>>, %arg5: memref<1x320x128xf32, #tpu.memory_space<vmem>>, %arg6: memref<10x10x128xf32, #tpu.memory_space<vmem>>, %arg7: memref<18x18x128xf32, #tpu.memory_space<vmem>>) attributes {dimension_semantics = [#tpu.dimension_semantics<parallel>, #tpu.dimension_semantics<parallel>], iteration_bounds = array<i64: 2, 1>, scalar_prefetch = 0 : i64, scratch_operands = 2 : i64, tpu.core_type = #tpu.core_type<tc>, window_params = [{transform_indices = @transform_0, window_bounds = array<i64: 1, 320, 128>}, {transform_indices = @transform_1, window_bounds = array<i64: 9, 128>}, {transform_indices = @transform_2, window_bounds = array<i64: 1, 128>}, {transform_indices = @transform_3, window_bounds = array<i64: 1, 320, 128>}]} {
    %c0 = arith.constant 0 : index
    %c0_0 = arith.constant 0 : index
    %0 = vector.load %arg3[%c0, %c0_0] : memref<9x128xf32, #tpu.memory_space<vmem>>, vector<9x128xf32>
    %c0_1 = arith.constant 0 : index
    %c0_2 = arith.constant 0 : index
    %1 = vector.load %arg4[%c0_1, %c0_2] : memref<1x128xf32, #tpu.memory_space<vmem>>, vector<1x128xf32>
    %2 = vector.shape_cast %1 : vector<1x128xf32> to vector<128xf32>
    %cst = arith.constant 0.000000e+00 : f32
    %3 = vector.broadcast %cst : f32 to vector<1x10x128xf32>
    %c0_3 = arith.constant 0 : index
    %c0_4 = arith.constant 0 : index
    %c0_5 = arith.constant 0 : index
    %4 = vector.load %arg6[%c0_3, %c0_4, %c0_5] : memref<10x10x128xf32, #tpu.memory_space<vmem>>, vector<1x10x128xf32>
    tpu.vector_store %arg6[%c0_3, %c0_4, %c0_5], %3 {strides = array<i32>} : memref<10x10x128xf32, #tpu.memory_space<vmem>>, vector<1x10x128xf32>,
    %c9 = arith.constant 9 : index
    %c0_6 = arith.constant 0 : index
    %c0_7 = arith.constant 0 : index
    %5 = vector.load %arg6[%c9, %c0_6, %c0_7] : memref<10x10x128xf32, #tpu.memory_space<vmem>>, vector<1x10x128xf32>
    tpu.vector_store %arg6[%c9, %c0_6, %c0_7], %3 {strides = array<i32>} : memref<10x10x128xf32, #tpu.memory_space<vmem>>, vector<1x10x128xf32>,
    %cst_8 = arith.constant 0.000000e+00 : f32
    %6 = vector.broadcast %cst_8 : f32 to vector<8x1x128xf32>
    %c1 = arith.constant 1 : index
    %c0_9 = arith.constant 0 : index
    %c0_10 = arith.constant 0 : index
    %7 = vector.load %arg6[%c1, %c0_9, %c0_10] : memref<10x10x128xf32, #tpu.memory_space<vmem>>, vector<8x1x128xf32>
    tpu.vector_store %arg6[%c1, %c0_9, %c0_10], %6 {strides = array<i32>} : memref<10x10x128xf32, #tpu.memory_space<vmem>>, vector<8x1x128xf32>,
    %c1_11 = arith.constant 1 : index
    %c9_12 = arith.constant 9 : index
    %c0_13 = arith.constant 0 : index
    %8 = vector.load %arg6[%c1_11, %c9_12, %c0_13] : memref<10x10x128xf32, #tpu.memory_space<vmem>>, vector<8x1x128xf32>
    tpu.vector_store %arg6[%c1_11, %c9_12, %c0_13], %6 {strides = array<i32>} : memref<10x10x128xf32, #tpu.memory_space<vmem>>, vector<8x1x128xf32>,
    %c0_14 = arith.constant 0 : index
    %c0_15 = arith.constant 0 : index
    %c0_16 = arith.constant 0 : index
    %9 = vector.load %arg2[%c0_14, %c0_15, %c0_16] : memref<1x320x128xf32, #tpu.memory_space<vmem>>, vector<1x64x128xf32>
    %10 = vector.shape_cast %9 : vector<1x64x128xf32> to vector<64x128xf32>
    %11 = vector.shape_cast %10 : vector<64x128xf32> to vector<8x8x128xf32>
    %c1_17 = arith.constant 1 : index
    %c1_18 = arith.constant 1 : index
    %c0_19 = arith.constant 0 : index
    %12 = vector.load %arg6[%c1_17, %c1_18, %c0_19] : memref<10x10x128xf32, #tpu.memory_space<vmem>>, vector<8x8x128xf32>
    tpu.vector_store %arg6[%c1_17, %c1_18, %c0_19], %11 {strides = array<i32>} : memref<10x10x128xf32, #tpu.memory_space<vmem>>, vector<8x8x128xf32>,
    %c0_20 = arith.constant 0 : index
    %c0_21 = arith.constant 0 : index
    %c0_22 = arith.constant 0 : index
    %13 = vector.load %arg6[%c0_20, %c0_21, %c0_22] : memref<10x10x128xf32, #tpu.memory_space<vmem>>, vector<10x8x128xf32>
    %14 = vector.extract_strided_slice %13 {offsets = [0, 0, 0], sizes = [8, 8, 128], strides = [1, 1, 1]} : vector<10x8x128xf32> to vector<8x8x128xf32>
    %15 = vector.extract_strided_slice %0 {offsets = [0, 0], sizes = [1, 128], strides = [1, 1]} : vector<9x128xf32> to vector<1x128xf32>
    %16 = vector.shape_cast %15 : vector<1x128xf32> to vector<128xf32>
    %17 = vector.shape_cast %16 : vector<128xf32> to vector<1x1x128xf32>
    %18 = vector.broadcast %17 : vector<1x1x128xf32> to vector<8x8x128xf32>
    %19 = arith.mulf %14, %18 : vector<8x8x128xf32>
    %20 = vector.extract_strided_slice %13 {offsets = [1, 0, 0], sizes = [8, 8, 128], strides = [1, 1, 1]} : vector<10x8x128xf32> to vector<8x8x128xf32>
    %21 = vector.extract_strided_slice %0 {offsets = [3, 0], sizes = [1, 128], strides = [1, 1]} : vector<9x128xf32> to vector<1x128xf32>
    %22 = vector.shape_cast %21 : vector<1x128xf32> to vector<128xf32>
    %23 = vector.shape_cast %22 : vector<128xf32> to vector<1x1x128xf32>
    %24 = vector.broadcast %23 : vector<1x1x128xf32> to vector<8x8x128xf32>
    %25 = arith.mulf %20, %24 : vector<8x8x128xf32>
    %26 = arith.addf %19, %25 : vector<8x8x128xf32>
    %27 = vector.extract_strided_slice %13 {offsets = [2, 0, 0], sizes = [8, 8, 128], strides = [1, 1, 1]} : vector<10x8x128xf32> to vector<8x8x128xf32>
    %28 = vector.extract_strided_slice %0 {offsets = [6, 0], sizes = [1, 128], strides = [1, 1]} : vector<9x128xf32> to vector<1x128xf32>
    %29 = vector.shape_cast %28 : vector<1x128xf32> to vector<128xf32>
    %30 = vector.shape_cast %29 : vector<128xf32> to vector<1x1x128xf32>
    %31 = vector.broadcast %30 : vector<1x1x128xf32> to vector<8x8x128xf32>
    %32 = arith.mulf %27, %31 : vector<8x8x128xf32>
    %33 = arith.addf %26, %32 : vector<8x8x128xf32>
    %c0_23 = arith.constant 0 : index
    %c1_24 = arith.constant 1 : index
    %c0_25 = arith.constant 0 : index
    %34 = vector.load %arg6[%c0_23, %c1_24, %c0_25] : memref<10x10x128xf32, #tpu.memory_space<vmem>>, vector<10x8x128xf32>
    %35 = vector.extract_strided_slice %34 {offsets = [0, 0, 0], sizes = [8, 8, 128], strides = [1, 1, 1]} : vector<10x8x128xf32> to vector<8x8x128xf32>
    %36 = vector.extract_strided_slice %0 {offsets = [1, 0], sizes = [1, 128], strides = [1, 1]} : vector<9x128xf32> to vector<1x128xf32>
    %37 = vector.shape_cast %36 : vector<1x128xf32> to vector<128xf32>
    %38 = vector.shape_cast %37 : vector<128xf32> to vector<1x1x128xf32>
    %39 = vector.broadcast %38 : vector<1x1x128xf32> to vector<8x8x128xf32>
    %40 = arith.mulf %35, %39 : vector<8x8x128xf32>
    %41 = arith.addf %33, %40 : vector<8x8x128xf32>
    %42 = vector.extract_strided_slice %34 {offsets = [1, 0, 0], sizes = [8, 8, 128], strides = [1, 1, 1]} : vector<10x8x128xf32> to vector<8x8x128xf32>
    %43 = vector.extract_strided_slice %0 {offsets = [4, 0], sizes = [1, 128], strides = [1, 1]} : vector<9x128xf32> to vector<1x128xf32>
    %44 = vector.shape_cast %43 : vector<1x128xf32> to vector<128xf32>
    %45 = vector.shape_cast %44 : vector<128xf32> to vector<1x1x128xf32>
    %46 = vector.broadcast %45 : vector<1x1x128xf32> to vector<8x8x128xf32>
    %47 = arith.mulf %42, %46 : vector<8x8x128xf32>
    %48 = arith.addf %41, %47 : vector<8x8x128xf32>
    %49 = vector.extract_strided_slice %34 {offsets = [2, 0, 0], sizes = [8, 8, 128], strides = [1, 1, 1]} : vector<10x8x128xf32> to vector<8x8x128xf32>
    %50 = vector.extract_strided_slice %0 {offsets = [7, 0], sizes = [1, 128], strides = [1, 1]} : vector<9x128xf32> to vector<1x128xf32>
    %51 = vector.shape_cast %50 : vector<1x128xf32> to vector<128xf32>
    %52 = vector.shape_cast %51 : vector<128xf32> to vector<1x1x128xf32>
    %53 = vector.broadcast %52 : vector<1x1x128xf32> to vector<8x8x128xf32>
    %54 = arith.mulf %49, %53 : vector<8x8x128xf32>
    %55 = arith.addf %48, %54 : vector<8x8x128xf32>
    %c0_26 = arith.constant 0 : index
    %c2 = arith.constant 2 : index
    %c0_27 = arith.constant 0 : index
    %56 = vector.load %arg6[%c0_26, %c2, %c0_27] : memref<10x10x128xf32, #tpu.memory_space<vmem>>, vector<10x8x128xf32>
    %57 = vector.extract_strided_slice %56 {offsets = [0, 0, 0], sizes = [8, 8, 128], strides = [1, 1, 1]} : vector<10x8x128xf32> to vector<8x8x128xf32>
    %58 = vector.extract_strided_slice %0 {offsets = [2, 0], sizes = [1, 128], strides = [1, 1]} : vector<9x128xf32> to vector<1x128xf32>
    %59 = vector.shape_cast %58 : vector<1x128xf32> to vector<128xf32>
    %60 = vector.shape_cast %59 : vector<128xf32> to vector<1x1x128xf32>
    %61 = vector.broadcast %60 : vector<1x1x128xf32> to vector<8x8x128xf32>
    %62 = arith.mulf %57, %61 : vector<8x8x128xf32>
    %63 = arith.addf %55, %62 : vector<8x8x128xf32>
    %64 = vector.extract_strided_slice %56 {offsets = [1, 0, 0], sizes = [8, 8, 128], strides = [1, 1, 1]} : vector<10x8x128xf32> to vector<8x8x128xf32>
    %65 = vector.extract_strided_slice %0 {offsets = [5, 0], sizes = [1, 128], strides = [1, 1]} : vector<9x128xf32> to vector<1x128xf32>
    %66 = vector.shape_cast %65 : vector<1x128xf32> to vector<128xf32>
    %67 = vector.shape_cast %66 : vector<128xf32> to vector<1x1x128xf32>
    %68 = vector.broadcast %67 : vector<1x1x128xf32> to vector<8x8x128xf32>
    %69 = arith.mulf %64, %68 : vector<8x8x128xf32>
    %70 = arith.addf %63, %69 : vector<8x8x128xf32>
    %71 = vector.extract_strided_slice %56 {offsets = [2, 0, 0], sizes = [8, 8, 128], strides = [1, 1, 1]} : vector<10x8x128xf32> to vector<8x8x128xf32>
    %72 = vector.extract_strided_slice %0 {offsets = [8, 0], sizes = [1, 128], strides = [1, 1]} : vector<9x128xf32> to vector<1x128xf32>
    %73 = vector.shape_cast %72 : vector<1x128xf32> to vector<128xf32>
    %74 = vector.shape_cast %73 : vector<128xf32> to vector<1x1x128xf32>
    %75 = vector.broadcast %74 : vector<1x1x128xf32> to vector<8x8x128xf32>
    %76 = arith.mulf %71, %75 : vector<8x8x128xf32>
    %77 = arith.addf %70, %76 : vector<8x8x128xf32>
    %78 = vector.shape_cast %2 : vector<128xf32> to vector<1x1x128xf32>
    %79 = vector.broadcast %78 : vector<1x1x128xf32> to vector<8x8x128xf32>
    %80 = arith.addf %77, %79 : vector<8x8x128xf32>
    %81 = vector.shape_cast %80 : vector<8x8x128xf32> to vector<64x128xf32>
    %c0_28 = arith.constant 0 : index
    %c0_29 = arith.constant 0 : index
    %c0_30 = arith.constant 0 : index
    %82 = vector.load %arg5[%c0_28, %c0_29, %c0_30] : memref<1x320x128xf32, #tpu.memory_space<vmem>>, vector<1x64x128xf32>
    %83 = vector.shape_cast %82 : vector<1x64x128xf32> to vector<64x128xf32>
    %84 = vector.shape_cast %81 : vector<64x128xf32> to vector<1x64x128xf32>
    tpu.vector_store %arg5[%c0_28, %c0_29, %c0_30], %84 {strides = array<i32>} : memref<1x320x128xf32, #tpu.memory_space<vmem>>, vector<1x64x128xf32>,
    %cst_31 = arith.constant 0.000000e+00 : f32
    %85 = vector.broadcast %cst_31 : f32 to vector<1x18x128xf32>
    %c0_32 = arith.constant 0 : index
    %c0_33 = arith.constant 0 : index
    %c0_34 = arith.constant 0 : index
    %86 = vector.load %arg7[%c0_32, %c0_33, %c0_34] : memref<18x18x128xf32, #tpu.memory_space<vmem>>, vector<1x18x128xf32>
    tpu.vector_store %arg7[%c0_32, %c0_33, %c0_34], %85 {strides = array<i32>} : memref<18x18x128xf32, #tpu.memory_space<vmem>>, vector<1x18x128xf32>,
    %c17 = arith.constant 17 : index
    %c0_35 = arith.constant 0 : index
    %c0_36 = arith.constant 0 : index
    %87 = vector.load %arg7[%c17, %c0_35, %c0_36] : memref<18x18x128xf32, #tpu.memory_space<vmem>>, vector<1x18x128xf32>
    tpu.vector_store %arg7[%c17, %c0_35, %c0_36], %85 {strides = array<i32>} : memref<18x18x128xf32, #tpu.memory_space<vmem>>, vector<1x18x128xf32>,
    %cst_37 = arith.constant 0.000000e+00 : f32
    %88 = vector.broadcast %cst_37 : f32 to vector<16x1x128xf32>
    %c1_38 = arith.constant 1 : index
    %c0_39 = arith.constant 0 : index
    %c0_40 = arith.constant 0 : index
    %89 = vector.load %arg7[%c1_38, %c0_39, %c0_40] : memref<18x18x128xf32, #tpu.memory_space<vmem>>, vector<16x1x128xf32>
    tpu.vector_store %arg7[%c1_38, %c0_39, %c0_40], %88 {strides = array<i32>} : memref<18x18x128xf32, #tpu.memory_space<vmem>>, vector<16x1x128xf32>,
    %c1_41 = arith.constant 1 : index
    %c17_42 = arith.constant 17 : index
    %c0_43 = arith.constant 0 : index
    %90 = vector.load %arg7[%c1_41, %c17_42, %c0_43] : memref<18x18x128xf32, #tpu.memory_space<vmem>>, vector<16x1x128xf32>
    tpu.vector_store %arg7[%c1_41, %c17_42, %c0_43], %88 {strides = array<i32>} : memref<18x18x128xf32, #tpu.memory_space<vmem>>, vector<16x1x128xf32>,
    %c0_44 = arith.constant 0 : index
    %c64 = arith.constant 64 : index
    %c0_45 = arith.constant 0 : index
    %91 = vector.load %arg2[%c0_44, %c64, %c0_45] : memref<1x320x128xf32, #tpu.memory_space<vmem>>, vector<1x256x128xf32>
    %92 = vector.shape_cast %91 : vector<1x256x128xf32> to vector<256x128xf32>
    %93 = vector.shape_cast %92 : vector<256x128xf32> to vector<16x16x128xf32>
    %c1_46 = arith.constant 1 : index
    %c1_47 = arith.constant 1 : index
    %c0_48 = arith.constant 0 : index
    %94 = vector.load %arg7[%c1_46, %c1_47, %c0_48] : memref<18x18x128xf32, #tpu.memory_space<vmem>>, vector<16x16x128xf32>
    tpu.vector_store %arg7[%c1_46, %c1_47, %c0_48], %93 {strides = array<i32>} : memref<18x18x128xf32, #tpu.memory_space<vmem>>, vector<16x16x128xf32>,
    %c0_49 = arith.constant 0 : index
    %c0_50 = arith.constant 0 : index
    %c0_51 = arith.constant 0 : index
    %95 = vector.load %arg7[%c0_49, %c0_50, %c0_51] : memref<18x18x128xf32, #tpu.memory_space<vmem>>, vector<18x16x128xf32>
    %96 = vector.extract_strided_slice %95 {offsets = [0, 0, 0], sizes = [16, 16, 128], strides = [1, 1, 1]} : vector<18x16x128xf32> to vector<16x16x128xf32>
    %97 = vector.extract_strided_slice %0 {offsets = [0, 0], sizes = [1, 128], strides = [1, 1]} : vector<9x128xf32> to vector<1x128xf32>
    %98 = vector.shape_cast %97 : vector<1x128xf32> to vector<128xf32>
    %99 = vector.shape_cast %98 : vector<128xf32> to vector<1x1x128xf32>
    %100 = vector.broadcast %99 : vector<1x1x128xf32> to vector<16x16x128xf32>
    %101 = arith.mulf %96, %100 : vector<16x16x128xf32>
    %102 = vector.extract_strided_slice %95 {offsets = [1, 0, 0], sizes = [16, 16, 128], strides = [1, 1, 1]} : vector<18x16x128xf32> to vector<16x16x128xf32>
    %103 = vector.extract_strided_slice %0 {offsets = [3, 0], sizes = [1, 128], strides = [1, 1]} : vector<9x128xf32> to vector<1x128xf32>
    %104 = vector.shape_cast %103 : vector<1x128xf32> to vector<128xf32>
    %105 = vector.shape_cast %104 : vector<128xf32> to vector<1x1x128xf32>
    %106 = vector.broadcast %105 : vector<1x1x128xf32> to vector<16x16x128xf32>
    %107 = arith.mulf %102, %106 : vector<16x16x128xf32>
    %108 = arith.addf %101, %107 : vector<16x16x128xf32>
    %109 = vector.extract_strided_slice %95 {offsets = [2, 0, 0], sizes = [16, 16, 128], strides = [1, 1, 1]} : vector<18x16x128xf32> to vector<16x16x128xf32>
    %110 = vector.extract_strided_slice %0 {offsets = [6, 0], sizes = [1, 128], strides = [1, 1]} : vector<9x128xf32> to vector<1x128xf32>
    %111 = vector.shape_cast %110 : vector<1x128xf32> to vector<128xf32>
    %112 = vector.shape_cast %111 : vector<128xf32> to vector<1x1x128xf32>
    %113 = vector.broadcast %112 : vector<1x1x128xf32> to vector<16x16x128xf32>
    %114 = arith.mulf %109, %113 : vector<16x16x128xf32>
    %115 = arith.addf %108, %114 : vector<16x16x128xf32>
    %c0_52 = arith.constant 0 : index
    %c1_53 = arith.constant 1 : index
    %c0_54 = arith.constant 0 : index
    %116 = vector.load %arg7[%c0_52, %c1_53, %c0_54] : memref<18x18x128xf32, #tpu.memory_space<vmem>>, vector<18x16x128xf32>
    %117 = vector.extract_strided_slice %116 {offsets = [0, 0, 0], sizes = [16, 16, 128], strides = [1, 1, 1]} : vector<18x16x128xf32> to vector<16x16x128xf32>
    %118 = vector.extract_strided_slice %0 {offsets = [1, 0], sizes = [1, 128], strides = [1, 1]} : vector<9x128xf32> to vector<1x128xf32>
    %119 = vector.shape_cast %118 : vector<1x128xf32> to vector<128xf32>
    %120 = vector.shape_cast %119 : vector<128xf32> to vector<1x1x128xf32>
    %121 = vector.broadcast %120 : vector<1x1x128xf32> to vector<16x16x128xf32>
    %122 = arith.mulf %117, %121 : vector<16x16x128xf32>
    %123 = arith.addf %115, %122 : vector<16x16x128xf32>
    %124 = vector.extract_strided_slice %116 {offsets = [1, 0, 0], sizes = [16, 16, 128], strides = [1, 1, 1]} : vector<18x16x128xf32> to vector<16x16x128xf32>
    %125 = vector.extract_strided_slice %0 {offsets = [4, 0], sizes = [1, 128], strides = [1, 1]} : vector<9x128xf32> to vector<1x128xf32>
    %126 = vector.shape_cast %125 : vector<1x128xf32> to vector<128xf32>
    %127 = vector.shape_cast %126 : vector<128xf32> to vector<1x1x128xf32>
    %128 = vector.broadcast %127 : vector<1x1x128xf32> to vector<16x16x128xf32>
    %129 = arith.mulf %124, %128 : vector<16x16x128xf32>
    %130 = arith.addf %123, %129 : vector<16x16x128xf32>
    %131 = vector.extract_strided_slice %116 {offsets = [2, 0, 0], sizes = [16, 16, 128], strides = [1, 1, 1]} : vector<18x16x128xf32> to vector<16x16x128xf32>
    %132 = vector.extract_strided_slice %0 {offsets = [7, 0], sizes = [1, 128], strides = [1, 1]} : vector<9x128xf32> to vector<1x128xf32>
    %133 = vector.shape_cast %132 : vector<1x128xf32> to vector<128xf32>
    %134 = vector.shape_cast %133 : vector<128xf32> to vector<1x1x128xf32>
    %135 = vector.broadcast %134 : vector<1x1x128xf32> to vector<16x16x128xf32>
    %136 = arith.mulf %131, %135 : vector<16x16x128xf32>
    %137 = arith.addf %130, %136 : vector<16x16x128xf32>
    %c0_55 = arith.constant 0 : index
    %c2_56 = arith.constant 2 : index
    %c0_57 = arith.constant 0 : index
    %138 = vector.load %arg7[%c0_55, %c2_56, %c0_57] : memref<18x18x128xf32, #tpu.memory_space<vmem>>, vector<18x16x128xf32>
    %139 = vector.extract_strided_slice %138 {offsets = [0, 0, 0], sizes = [16, 16, 128], strides = [1, 1, 1]} : vector<18x16x128xf32> to vector<16x16x128xf32>
    %140 = vector.extract_strided_slice %0 {offsets = [2, 0], sizes = [1, 128], strides = [1, 1]} : vector<9x128xf32> to vector<1x128xf32>
    %141 = vector.shape_cast %140 : vector<1x128xf32> to vector<128xf32>
    %142 = vector.shape_cast %141 : vector<128xf32> to vector<1x1x128xf32>
    %143 = vector.broadcast %142 : vector<1x1x128xf32> to vector<16x16x128xf32>
    %144 = arith.mulf %139, %143 : vector<16x16x128xf32>
    %145 = arith.addf %137, %144 : vector<16x16x128xf32>
    %146 = vector.extract_strided_slice %138 {offsets = [1, 0, 0], sizes = [16, 16, 128], strides = [1, 1, 1]} : vector<18x16x128xf32> to vector<16x16x128xf32>
    %147 = vector.extract_strided_slice %0 {offsets = [5, 0], sizes = [1, 128], strides = [1, 1]} : vector<9x128xf32> to vector<1x128xf32>
    %148 = vector.shape_cast %147 : vector<1x128xf32> to vector<128xf32>
    %149 = vector.shape_cast %148 : vector<128xf32> to vector<1x1x128xf32>
    %150 = vector.broadcast %149 : vector<1x1x128xf32> to vector<16x16x128xf32>
    %151 = arith.mulf %146, %150 : vector<16x16x128xf32>
    %152 = arith.addf %145, %151 : vector<16x16x128xf32>
    %153 = vector.extract_strided_slice %138 {offsets = [2, 0, 0], sizes = [16, 16, 128], strides = [1, 1, 1]} : vector<18x16x128xf32> to vector<16x16x128xf32>
    %154 = vector.extract_strided_slice %0 {offsets = [8, 0], sizes = [1, 128], strides = [1, 1]} : vector<9x128xf32> to vector<1x128xf32>
    %155 = vector.shape_cast %154 : vector<1x128xf32> to vector<128xf32>
    %156 = vector.shape_cast %155 : vector<128xf32> to vector<1x1x128xf32>
    %157 = vector.broadcast %156 : vector<1x1x128xf32> to vector<16x16x128xf32>
    %158 = arith.mulf %153, %157 : vector<16x16x128xf32>
    %159 = arith.addf %152, %158 : vector<16x16x128xf32>
    %160 = vector.shape_cast %2 : vector<128xf32> to vector<1x1x128xf32>
    %161 = vector.broadcast %160 : vector<1x1x128xf32> to vector<16x16x128xf32>
    %162 = arith.addf %159, %161 : vector<16x16x128xf32>
    %163 = vector.shape_cast %162 : vector<16x16x128xf32> to vector<256x128xf32>
    %c0_58 = arith.constant 0 : index
    %c64_59 = arith.constant 64 : index
    %c0_60 = arith.constant 0 : index
    %164 = vector.load %arg5[%c0_58, %c64_59, %c0_60] : memref<1x320x128xf32, #tpu.memory_space<vmem>>, vector<1x256x128xf32>
    %165 = vector.shape_cast %164 : vector<1x256x128xf32> to vector<256x128xf32>
    %166 = vector.shape_cast %163 : vector<256x128xf32> to vector<1x256x128xf32>
    tpu.vector_store %arg5[%c0_58, %c64_59, %c0_60], %166 {strides = array<i32>} : memref<1x320x128xf32, #tpu.memory_space<vmem>>, vector<1x256x128xf32>,
    return
  }
  func.func @transform_0(%arg0: i32, %arg1: i32) -> (i32, i32, i32) {
    %c0_i32 = arith.constant 0 : i32
    %c0_i32_0 = arith.constant 0 : i32
    return %arg0, %c0_i32, %arg1 : i32, i32, i32
  }
  func.func @transform_1(%arg0: i32, %arg1: i32) -> (i32, i32) {
    %c0_i32 = arith.constant 0 : i32
    %c0_i32_0 = arith.constant 0 : i32
    return %c0_i32, %arg1 : i32, i32
  }
  func.func @transform_2(%arg0: i32, %arg1: i32) -> (i32, i32) {
    %c0_i32 = arith.constant 0 : i32
    %c0_i32_0 = arith.constant 0 : i32
    return %c0_i32, %arg1 : i32, i32
  }
  func.func @transform_3(%arg0: i32, %arg1: i32) -> (i32, i32, i32) {
    %c0_i32 = arith.constant 0 : i32
    %c0_i32_0 = arith.constant 0 : i32
    return %arg0, %c0_i32, %arg1 : i32, i32, i32
  }
}

</mosaic_0001>

<bundles_post_ra>
// kernel: tpu_custom_call.1
= control target key start
LH: loop header
LB: loop body
LE: loop exit
PB: predicated region body
PF: predicated region fallthrough
CT: control target
= control target key end

     0   :  { %8 = vsyncpa [#allocation5], 0  ;;  %s2974_s0 = inlined_call_operand.hbm [shape: f32[2,320,128], index: 0, kind: input, shape index: {}]   ;;  %s2975_s1 = inlined_call_operand.hbm [shape: f32[9,128], index: 1, kind: input, shape index: {}]   ;;  %s2976_s2 = inlined_call_operand.vmem [shape: f32[1,128], index: 2, kind: input, shape index: {}]   ;;  %s2977_s3 = inlined_call_operand.hbm [shape: f32[2,320,128], index: 3, kind: output, shape index: {}]  }
   0x1   :  { %10 = vsyncpa [#allocation5 + $0x1], 0 }
   0x2   :  { %11 = vsyncpa [#allocation8], 0 }
   0x3   :  { %12 = vsyncpa [#allocation6], 0 }
   0x4   :  { %14 = vsyncpa [#allocation6 + $0x1], 0  ;;  %s1726_s12 = smov 0   ;;  %s1728_s13 = smov 0  }
   0x5   :  { %s1730_s14 = smov 0   ;;  %s1732_s15 = smov 0  }
   0x6   :  { %s1734_s16 = smov 0   ;;  %s1736_s17 = smov 0  }
   0x7 LB: > { %s1451_s18 = sadd.s32 4294967295, %s1696_s17   ;;  %s1452_s19 = sadd.s32 4294967294, %s1696_s17   ;;  %s1696_s17 = sphi %s1736_s17, %s20_s17   ;;  %s1692_s16 = sphi %s1734_s16, %s3004_s16   ;;  %s1688_s15 = sphi %s1732_s15, %s3003_s15   ;;  %s1684_s14 = sphi %s1730_s14, %s3002_s14   ;;  %s1680_s13 = sphi %s1728_s13, %s3001_s13   ;;  %s1676_s12 = sphi %s1726_s12, %s3000_s12  }
   0x8   : > { %p54_p0 = scmp.ne.s32.totalorder %s1680_s13, %s1676_s12  ;;  %p1760_p1 = scmp.eq.s32.totalorder %s1451_s18, 0 }
   0x9   : > { %p1764_p2 = scmp.eq.s32.totalorder %s1451_s18, 1  ;;  %p138_p3 = scmp.eq.s32.totalorder %s1452_s19, 1 }
   0xa   : > { %s2984_s20 = scalar_select %p1760_p1, 1, 0 }
   0xb   : > { %s2985_s21 = scalar_select %p1764_p2, 1, 0 }
   0xc   : > { %p1770_p4 = por %p1760_p1, %p54_p0  ;;  %p1453_p5 = scmp.ge.s32.totalorder %s1696_s17, 1 }
   0xd   : > { %p1775_p6 = por %p138_p3, %p54_p0  ;;  %p145_p7 = scmp.lt.s32.totalorder %s1696_s17, 3 }
   0xe   : > { %s2986_s22 = scalar_select %p1770_p4, 1, 0 }
   0xf   : > { %s2987_s23 = scalar_select %p1775_p6, 1, 0 }
  0x10   : > { %p1780_p8 = pnand %p1453_p5, %p145_p7  ;;  %s1698_s25 = smov [#allocation7]  }
  0x11   : > { %s159_s26 = sshll.u32 %s1698_s25, 4  ;;  %s32_s28 = sadd.s32 1, %s1692_s16  ;;  %s160_s26 = int_to_ptr.vmem [resolvable:$true] %s159_s26 }
  0x12   : > { %s2988_s24 = scalar_select %p1780_p8, 1, 0 }
  0x13   : > { %p1477_p9 = pneg %p1780_p8  ;;  %s1552_s4 = scalar_lea.hbm %s2975_s1, 256 }
  0x14   : > { %p1553_p12 = scmp.ne.s32.totalorder %s2975_s1, %s1552_s4  ;;  %p1559_p5 = scmp.lt.u32.totalorder %s1552_s4, %s2975_s1 }
  0x15   : > { %p1789_p11 = pnand %p1477_p9, %p1760_p1 }
  0x17   : > { %p1554_p13 = pneg %p1789_p11 }
  0x19   : > { %p1555_p0 = pnand %p1554_p13, %p1553_p12 }
  0x1b   : > { %p1556_p3 = pneg %p1555_p0 }
  0x1d   : > { %p1561_p7 = pnand %p1559_p5, %p1556_p3 }
  0x1f   : > { %1564 = shalt.err (!%p1561_p7)
}
  0x20   : > { %s1565_s9 = scalar_lea.vmem %s160_s26, 256  ;;  %p1573_p1 = scmp.lt.s32.totalorder %s160_s26, %s160_s26 }
  0x21   : > { %p1566_p9 = scmp.ne.s32.totalorder %s160_s26, %s1565_s9  ;;  %p1574_p4 = scmp.lt.s32.totalorder %s1565_s9, %s1565_s9 }
  0x23   : > { %p1568_p10 = pnand %p1566_p9, %p1554_p13  ;;  %p1575_p8 = por %p1574_p4, %p1573_p1 }
  0x25   : > { %p1569_p6 = pneg %p1568_p10 }
  0x27   : > { %p1576_p2 = pnand %p1575_p8, %p1569_p6 }
  0x29   : > { %1579 = shalt.err (!%p1576_p2)
}
  0x2a   : > { %s1699_s10 = smov 128   ;;  %s1700_s11 = smov 8  }
  0x2b   : > { %1480 = dma.hbm_to_vmem [thread:$0]  (!%p1789_p11), %s2975_s1, 256, %s160_s26, [#allocation8], %s1699_s10, %s1699_s10, %s1700_s11  }
  0x2c   : > { %p34_p1 = scmp.ge.s32.totalorder %s32_s28, 2  ;;  %s41_s25 = sadd.s32 1, %s1684_s14 }
  0x2d   : > { %p48_p2 = scmp.ne.s32.totalorder %s1684_s14, %s1680_s13  ;;  %p49_p4 = scmp.eq.s32.totalorder %s1696_s17, 0 }
  0x2e   : > { %s3006_s28 = smov (%p34_p1, %s32_s28), 0  ;;  %p2990_p8 = scmp.ne.s32.totalorder %s2985_s21, 0 }
  0x2f   : > { %p50_p6 = por %p49_p4, %p48_p2  ;;  %s36_s27 = ssub.s32 %s1692_s16, %s3006_s28 }
  0x30   : > { %p1821_p10 = por %p2990_p8, %p48_p2  ;;  %p1490_p12 = scmp.lt.s32.totalorder %s1696_s17, 2 }
  0x31   : > { %p39_p13 = scmp.eq.s32.totalorder %s36_s27, 0  ;;  %s179_s30 = sand.u32 1, %s1684_s14  }
  0x32   : > { %s1465_s4 = smul.u32 320, %s179_s30  ;;  %p1833_p11 = pnand %p1490_p12, %p50_p6 }
  0x33   : > { %s1830_s5 = scalar_select %p39_p13, %s1684_s14, %s41_s25  }
  0x34   : > { %s1466_s26 = smul.u32 5120, %s1692_s16  ;;  %s183_s6 = scalar_lea.vmem [#allocation4], %s1465_s4 }
  0x35   : > { %s191_s7 = sshll.u32 %s183_s6, 4  ;;  %s1844_s19 = scalar_lea.sflag [#allocation5], %s179_s30  ;;  %s1842_s7 = int_to_ptr.vmem [resolvable:$true] %s191_s7 }
  0x36   : > { %s1840_s18 = scalar_lea.hbm %s2974_s0, %s1466_s26  ;;  %p1582_p3 = pneg %p1833_p11 }
  0x37   : > { %s1580_s25 = scalar_lea.hbm %s1840_s18, 5120  ;;  %s1585_s26 = scalar_lea.hbm %s2974_s0, 10240 }
  0x38   : > { %p1581_p0 = scmp.ne.s32.totalorder %s1840_s18, %s1580_s25  ;;  %p1586_p9 = scmp.lt.u32.totalorder %s1840_s18, %s2974_s0 }
  0x39   : > { %p1587_p1 = scmp.lt.u32.totalorder %s1585_s26, %s1580_s25  ;;  %p1589_p4 = scmp.lt.u32.totalorder %s1580_s25, %s1840_s18 }
  0x3a   : > { %p1583_p5 = pnand %p1582_p3, %p1581_p0 }
  0x3b   : > { %p1588_p2 = por %p1587_p1, %p1586_p9 }
  0x3c   : > { %p1584_p7 = pneg %p1583_p5 }
  0x3d   : > { %p1590_p6 = por %p1589_p4, %p1588_p2 }
  0x3f   : > { %p1591_p8 = pnand %p1590_p6, %p1584_p7 }
  0x41   : > { %1594 = shalt.err (!%p1591_p8)
}
  0x42   : > { %s1595_s30 = scalar_lea.vmem %s1842_s7, 5120  ;;  %s1701_s21 = smov [#allocation4]  }
  0x43   : > { %p1596_p12 = scmp.ne.s32.totalorder %s1842_s7, %s1595_s30  ;;  %s1600_s27 = sshll.u32 %s1701_s21, 4  ;;  %s1601_s27 = int_to_ptr.vmem [resolvable:$false] %s1600_s27 }
  0x44   : > { %s1602_s4 = scalar_lea.vmem %s1601_s27, 10240  ;;  %p1603_p5 = scmp.lt.s32.totalorder %s1842_s7, %s1601_s27 }
  0x45   : > { %p1598_p13 = pnand %p1596_p12, %p1582_p3  ;;  %p1604_p9 = scmp.lt.s32.totalorder %s1602_s4, %s1595_s30 }
  0x47   : > { %p1599_p0 = pneg %p1598_p13  ;;  %p1605_p1 = por %p1604_p9, %p1603_p5 }
  0x49   : > { %p1606_p2 = pnand %p1605_p1, %p1599_p0 }
  0x4b   : > { %1609 = shalt.err (!%p1606_p2)
}
  0x4c   : > { %1484 = dma.hbm_to_vmem [thread:$0]  (!%p1833_p11), %s1840_s18, 5120, %s1842_s7, %s1844_s19, %s1699_s10, %s1699_s10, %s1700_s11  }
  0x4d   : > { %p2993_p3 = scmp.ne.s32.totalorder %s2988_s24, 0 }
  0x4f   : > { %203 = sbr.rel (%p2993_p3) target bundleno = 342 (0x156), region = 32 }
  0x56   : > { %s1878_s25 = sand.u32 1, %s1680_s13   ;;  %p2994_p7 = scmp.ne.s32.totalorder %s2986_s22, 0 }
  0x57   : > { %s1467_s26 = smul.u32 320, %s1878_s25  ;;  %s206_s6 = scalar_lea.sflag [#allocation5], %s1878_s25 }
  0x59   : > { %s1884_s8 = scalar_lea.vmem [#allocation4], %s1467_s26 }
  0x5a   : > { %1663 = dma.done.wait (%p2994_p7), %s206_s6, 5120  }
  0x5b   : > { %1665 = vsyncadd (%p2994_p7), %s206_s6, 4294962176  ;;  %p2995_p11 = scmp.ne.s32.totalorder %s2984_s20, 0 }
  0x5d   : > { %1667 = dma.done.wait (%p2995_p11), [#allocation8], 256  }
  0x5e   : > { %1669 = vsyncadd (%p2995_p11), [#allocation8], 4294967040  ;;  %v1702_v0 = vmov 0.0   ;;  %v1895_v1 = vld [vmem:[%s1884_s8] sm:$0xff]  ;;  %v1898_v2 = vld [vmem:[%s1884_s8 + $0x8] sm:$0xff]  ;;  %v293_v10 = vlaneseq  ;;  %s2096_s24 = scalar_lea.vmem [#allocation9], %s1467_s26 }
  0x5f   : > { %245 = vst [vmem:[#allocation2] sm:$0xff] %v1702_v0  ;;  %246 = vst [vmem:[#allocation2 + $0x8] sm:$0x3] %v1702_v0  ;;  %v1901_v3 = vld [vmem:[%s1884_s8 + $0x10] sm:$0xff]  ;;  %v1907_v4 = vld [vmem:[%s1884_s8 + $0x18] sm:$0xff]  ;;  %s1468_s7 = smul.u32 5120, %s1688_s15 }
  0x60   : > { %248 = vst [vmem:[#allocation2 + $0x90] sm:$0xff] %v1702_v0  ;;  %249 = vst [vmem:[#allocation2 + $0x98] sm:$0x3] %v1702_v0  ;;  %v1910_v5 = vld [vmem:[%s1884_s8 + $0x20] sm:$0xff]  ;;  %v1913_v6 = vld [vmem:[%s1884_s8 + $0x28] sm:$0xff]  ;;  %v1975_v23 = vshrl.u32 %v293_v10, 7 }
  0x61   : > { %251 = vst [vmem:[#allocation2 + $0x10] sm:$0x1] %v1702_v0  ;;  %252 = vst [vmem:[#allocation2 + $0x20] sm:$0x1] %v1702_v0  ;;  %v1919_v7 = vld [vmem:[%s1884_s8 + $0x30] sm:$0xff]  ;;  %v1922_v8 = vld [vmem:[%s1884_s8 + $0x38] sm:$0xff]  ;;  %s2921_s30 = scalar_lea.hbm %s2977_s3, %s1468_s7 }
  0x62   : > { %253 = vst [vmem:[#allocation2 + $0x30] sm:$0x1] %v1702_v0  ;;  %254 = vst [vmem:[#allocation2 + $0x40] sm:$0x1] %v1702_v0  ;;  %v1925_v9 = vld [vmem:[%s1884_s8 + $0x40] sm:$0xff]  ;;  %v1931_v11 = vld [vmem:[%s1884_s8 + $0x48] sm:$0xff] }
  0x63   : > { %255 = vst [vmem:[#allocation2 + $0x50] sm:$0x1] %v1702_v0  ;;  %256 = vst [vmem:[#allocation2 + $0x60] sm:$0x1] %v1702_v0  ;;  %v1934_v12 = vld [vmem:[%s1884_s8 + $0x50] sm:$0xff]  ;;  %v1937_v13 = vld [vmem:[%s1884_s8 + $0x58] sm:$0xff] }
  0x64   : > { %257 = vst [vmem:[#allocation2 + $0x70] sm:$0x1] %v1702_v0  ;;  %258 = vst [vmem:[#allocation2 + $0x80] sm:$0x1] %v1702_v0  ;;  %v1943_v14 = vld [vmem:[%s1884_s8 + $0x60] sm:$0xff]  ;;  %v1946_v15 = vld [vmem:[%s1884_s8 + $0x68] sm:$0xff] }
  0x65   : > { %259 = vst [vmem:[#allocation2 + $0x19] sm:$0x1] %v1702_v0  ;;  %260 = vst [vmem:[#allocation2 + $0x29] sm:$0x1] %v1702_v0  ;;  %v1949_v16 = vld [vmem:[%s1884_s8 + $0x70] sm:$0xff]  ;;  %v1955_v17 = vld [vmem:[%s1884_s8 + $0x78] sm:$0xff] }
  0x66   : > { %261 = vst [vmem:[#allocation2 + $0x39] sm:$0x1] %v1702_v0  ;;  %262 = vst [vmem:[#allocation2 + $0x49] sm:$0x1] %v1702_v0  ;;  %v1958_v18 = vld [vmem:[%s1884_s8 + $0x80] sm:$0xff]  ;;  %v1961_v19 = vld [vmem:[%s1884_s8 + $0x88] sm:$0xff] }
  0x67   : > { %263 = vst [vmem:[#allocation2 + $0x59] sm:$0x1] %v1702_v0  ;;  %264 = vst [vmem:[#allocation2 + $0x69] sm:$0x1] %v1702_v0  ;;  %v1967_v20 = vld [vmem:[%s1884_s8 + $0x90] sm:$0xff]  ;;  %v1970_v21 = vld [vmem:[%s1884_s8 + $0x98] sm:$0xff] }
  0x68   : > { %265 = vst [vmem:[#allocation2 + $0x79] sm:$0x1] %v1702_v0  ;;  %266 = vst [vmem:[#allocation2 + $0x89] sm:$0x1] %v1702_v0  ;;  %v1973_v22 = vld [vmem:[%s1884_s8 + $0xa0] sm:$0xff]  ;;  %v1981_v24 = vld [vmem:[%s1884_s8 + $0xa8] sm:$0xff] }
  0x69   : > { %507 = vst [vmem:[#allocation3] sm:$0xff] %v1702_v0  ;;  %508 = vst [vmem:[#allocation3 + $0x8] sm:$0xff] %v1702_v0  ;;  %v561_v25 = vld [vmem:[%s1884_s8 + $0xb0] sm:$0xff]  ;;  %v562_v26 = vld [vmem:[%s1884_s8 + $0xb8] sm:$0xff]  ;;  %v295_v36 = vsub.s32 0, %v1975_v23  ;;  %v307_v37 = vsub.s32 3, %v1975_v23 }
  0x6a   : > { %509 = vst [vmem:[#allocation3 + $0x10] sm:$0x3] %v1702_v0  ;;  %511 = vst [vmem:[#allocation3 + $0x198] sm:$0xff] %v1702_v0  ;;  %v563_v27 = vld [vmem:[%s1884_s8 + $0xc0] sm:$0xff]  ;;  %v564_v28 = vld [vmem:[%s1884_s8 + $0xc8] sm:$0xff]  ;;  %v327_v38 = vsub.s32 6, %v1975_v23 }
  0x6b   : > { %512 = vst [vmem:[#allocation3 + $0x1a0] sm:$0xff] %v1702_v0  ;;  %513 = vst [vmem:[#allocation3 + $0x1a8] sm:$0x3] %v1702_v0  ;;  %v565_v29 = vld [vmem:[%s1884_s8 + $0xd0] sm:$0xff]  ;;  %v566_v30 = vld [vmem:[%s1884_s8 + $0xd8] sm:$0xff]  ;;  %v447_v42 = vsub.s32 5, %v1975_v23 }
  0x6c   : > { %515 = vst [vmem:[#allocation3 + $0x18] sm:$0x1] %v1702_v0  ;;  %516 = vst [vmem:[#allocation3 + $0x30] sm:$0x1] %v1702_v0  ;;  %v567_v31 = vld [vmem:[%s1884_s8 + $0xe0] sm:$0xff]  ;;  %v568_v32 = vld [vmem:[%s1884_s8 + $0xe8] sm:$0xff] }
  0x6d   : > { %517 = vst [vmem:[#allocation3 + $0x48] sm:$0x1] %v1702_v0  ;;  %518 = vst [vmem:[#allocation3 + $0x60] sm:$0x1] %v1702_v0  ;;  %v569_v33 = vld [vmem:[%s1884_s8 + $0xf0] sm:$0xff]  ;;  %v570_v34 = vld [vmem:[%s1884_s8 + $0xf8] sm:$0xff] }
  0x6e   : > { %519 = vst [vmem:[#allocation3 + $0x78] sm:$0x1] %v1702_v0  ;;  %520 = vst [vmem:[#allocation3 + $0x90] sm:$0x1] %v1702_v0  ;;  %v571_v35 = vld [vmem:[%s1884_s8 + $0x100] sm:$0xff]  ;;  %v572_v39 = vld [vmem:[%s1884_s8 + $0x108] sm:$0xff] }
  0x6f   : > { %521 = vst [vmem:[#allocation3 + $0xa8] sm:$0x1] %v1702_v0  ;;  %522 = vst [vmem:[#allocation3 + $0xc0] sm:$0x1] %v1702_v0  ;;  %v573_v40 = vld [vmem:[%s1884_s8 + $0x110] sm:$0xff]  ;;  %v574_v41 = vld [vmem:[%s1884_s8 + $0x118] sm:$0xff] }
  0x70   : > { %523 = vst [vmem:[#allocation3 + $0xd8] sm:$0x1] %v1702_v0  ;;  %524 = vst [vmem:[#allocation3 + $0xf0] sm:$0x1] %v1702_v0  ;;  %v575_v43 = vld [vmem:[%s1884_s8 + $0x120] sm:$0xff]  ;;  %v576_v44 = vld [vmem:[%s1884_s8 + $0x128] sm:$0xff] }
  0x71   : > { %525 = vst [vmem:[#allocation3 + $0x108] sm:$0x1] %v1702_v0  ;;  %526 = vst [vmem:[#allocation3 + $0x120] sm:$0x1] %v1702_v0  ;;  %v577_v45 = vld [vmem:[%s1884_s8 + $0x130] sm:$0xff]  ;;  %v357_v46 = vsub.s32 1, %v1975_v23 }
  0x72   : > { %527 = vst [vmem:[#allocation3 + $0x138] sm:$0x1] %v1702_v0  ;;  %528 = vst [vmem:[#allocation3 + $0x150] sm:$0x1] %v1702_v0  ;;  %v578_v47 = vld [vmem:[%s1884_s8 + $0x138] sm:$0xff]  ;;  %v242_v48 = vld [vmem:[#allocation7] sm:$0xff] }
  0x73   : > { %529 = vst [vmem:[#allocation3 + $0x168] sm:$0x1] %v1702_v0  ;;  %530 = vst [vmem:[#allocation3 + $0x180] sm:$0x1] %v1702_v0  ;;  %v377_v49 = vsub.s32 4, %v1975_v23  ;;  %v397_v50 = vsub.s32 7, %v1975_v23  ;;  %v2010_v54 = vrot.slane %v242_v48, %v295_v36  ;;  %v2012_v55 = vrot.slane %v242_v48, %v307_v37 }
  0x74   : > { %531 = vst [vmem:[#allocation3 + $0x29] sm:$0x1] %v1702_v0  ;;  %532 = vst [vmem:[#allocation3 + $0x41] sm:$0x1] %v1702_v0  ;;  %v427_v51 = vsub.s32 2, %v1975_v23  ;;  %v2014_v56 = vrot.slane %v242_v48, %v327_v38  ;;  %v345_v57 = vld [vmem:[#allocation2 + $0x1] sm:$0xff]  ;;  %v2016_v58 = vrot.slane %v242_v48, %v447_v42  ;;  %v2022_v61 = vrot.slane %v242_v48, %v357_v46 }
  0x75   : > { %533 = vst [vmem:[#allocation3 + $0x59] sm:$0x1] %v1702_v0  ;;  %534 = vst [vmem:[#allocation3 + $0x71] sm:$0x1] %v1702_v0  ;;  %v2019_v59 = vmul.f32 0.0, %v2010_v54  ;;  %v415_v62 = vld [vmem:[#allocation2 + $0x2] sm:$0xff]  ;;  %v2025_v10 = vrot.slane %v242_v48, %v377_v49  ;;  %v2027_v23 = vrot.slane %v242_v48, %v397_v50 }
  0x76   : > { %535 = vst [vmem:[#allocation3 + $0x89] sm:$0x1] %v1702_v0  ;;  %536 = vst [vmem:[#allocation3 + $0xa1] sm:$0x1] %v1702_v0  ;;  %s1342_s18 = sshll.u32 %s2096_s24, 4  ;;  %s1328_s15 = scalar_lea.sflag [#allocation6], %s1878_s25  ;;  %s2924_s18 = int_to_ptr.vmem [resolvable:$true] %s1342_s18 }
  0x77   : > { %537 = vst [vmem:[#allocation3 + $0xb9] sm:$0x1] %v1702_v0  ;;  %538 = vst [vmem:[#allocation3 + $0xd1] sm:$0x1] %v1702_v0  ;;  %v400_v49 = vmul.f32 %v2027_v23, %v1901_v3  ;;  %s1610_s21 = scalar_lea.vmem %s2924_s18, 5120  ;;  %s1703_s27 = smov [#allocation9]  }
  0x78   : > { %539 = vst [vmem:[#allocation3 + $0xe9] sm:$0x1] %v1702_v0  ;;  %540 = vst [vmem:[#allocation3 + $0x101] sm:$0x1] %v1702_v0  ;;  %p1611_p4 = scmp.ne.s32.totalorder %s2924_s18, %s1610_s21  ;;  %s1614_s4 = sshll.u32 %s1703_s27, 4  ;;  %s1615_s4 = int_to_ptr.vmem [resolvable:$false] %s1614_s4 }
  0x79   : > { %541 = vst [vmem:[#allocation3 + $0x119] sm:$0x1] %v1702_v0  ;;  %542 = vst [vmem:[#allocation3 + $0x131] sm:$0x1] %v1702_v0  ;;  %s1616_s26 = scalar_lea.vmem %s1615_s4, 10240  ;;  %p1617_p12 = scmp.lt.s32.totalorder %s2924_s18, %s1615_s4 }
  0x7a   : > { %543 = vst [vmem:[#allocation3 + $0x149] sm:$0x1] %v1702_v0  ;;  %544 = vst [vmem:[#allocation3 + $0x161] sm:$0x1] %v1702_v0  ;;  %p1612_p6 = pnand %p1611_p4, %p1821_p10  ;;  %p1618_p13 = scmp.lt.s32.totalorder %s1616_s26, %s1610_s21 }
  0x7b   : > { %545 = vst [vmem:[#allocation3 + $0x179] sm:$0x1] %v1702_v0  ;;  %546 = vst [vmem:[#allocation3 + $0x191] sm:$0x1] %v1702_v0 }
  0x7c   : > { %275 = vst [vmem:[#allocation2 + $0x11] sm:$0xff] %v1895_v1  ;;  %276 = vst [vmem:[#allocation2 + $0x21] sm:$0xff] %v1898_v2  ;;  %p1613_p8 = pneg %p1612_p6  ;;  %p1619_p0 = por %p1618_p13, %p1617_p12 }
  0x7d   : > { %277 = vst [vmem:[#allocation2 + $0x31] sm:$0xff] %v1901_v3  ;;  %278 = vst [vmem:[#allocation2 + $0x41] sm:$0xff] %v1907_v4 }
  0x7e   : > { %279 = vst [vmem:[#allocation2 + $0x51] sm:$0xff] %v1910_v5  ;;  %280 = vst [vmem:[#allocation2 + $0x61] sm:$0xff] %v1913_v6  ;;  %p1620_p5 = pnand %p1619_p0, %p1613_p8 }
  0x7f   : > { %281 = vst [vmem:[#allocation2 + $0x71] sm:$0xff] %v1919_v7  ;;  %282 = vst [vmem:[#allocation2 + $0x81] sm:$0xff] %v1922_v8 }
  0x80   : > { %579 = vst [vmem:[#allocation3 + $0x19] sm:$0xff] %v1925_v9  ;;  %580 = vst [vmem:[#allocation3 + $0x21] sm:$0xff] %v1931_v11 }
  0x81   : > { %581 = vst [vmem:[#allocation3 + $0x31] sm:$0xff] %v1934_v12  ;;  %582 = vst [vmem:[#allocation3 + $0x39] sm:$0xff] %v1937_v13 }
  0x82   : > { %583 = vst [vmem:[#allocation3 + $0x49] sm:$0xff] %v1943_v14  ;;  %584 = vst [vmem:[#allocation3 + $0x51] sm:$0xff] %v1946_v15 }
  0x83   : > { %585 = vst [vmem:[#allocation3 + $0x61] sm:$0xff] %v1949_v16  ;;  %586 = vst [vmem:[#allocation3 + $0x69] sm:$0xff] %v1955_v17  ;;  %v284_v52 = vld [vmem:[#allocation2 + $0x10] sm:$0xff]  ;;  %v285_v53 = vld [vmem:[#allocation2 + $0x20] sm:$0xff] }
  0x84   : > { %587 = vst [vmem:[#allocation3 + $0x79] sm:$0xff] %v1958_v18  ;;  %588 = vst [vmem:[#allocation3 + $0x81] sm:$0xff] %v1961_v19  ;;  %v309_v60 = vmul.f32 %v2012_v55, %v284_v52  ;;  %v416_v63 = vld [vmem:[#allocation2 + $0x12] sm:$0xff]  ;;  %v329_v0 = vmul.f32 %v2014_v56, %v285_v53 }
  0x85   : > { %589 = vst [vmem:[#allocation3 + $0x91] sm:$0xff] %v1967_v20  ;;  %590 = vst [vmem:[#allocation3 + $0x99] sm:$0xff] %v1970_v21  ;;  %v449_v36 = vmul.f32 %v2016_v58, %v416_v63 }
  0x86   : > { %591 = vst [vmem:[#allocation3 + $0xa9] sm:$0xff] %v1973_v22  ;;  %2996 = vst [vmem:[#allocation13_spill] sm:$0xff] %v1981_v24 }
  0x87   : > { %592 = vst [vmem:[#allocation3 + $0xb1] sm:$0xff] %v1981_v24  ;;  %593 = vst [vmem:[#allocation3 + $0xc1] sm:$0xff] %v561_v25  ;;  %v2029_v25 = vrot.slane %v242_v48, %v427_v51 }
  0x88   : > { %594 = vst [vmem:[#allocation3 + $0xc9] sm:$0xff] %v562_v26  ;;  %595 = vst [vmem:[#allocation3 + $0xd9] sm:$0xff] %v563_v27  ;;  %v286_v26 = vld [vmem:[#allocation2 + $0x30] sm:$0xff]  ;;  %v2031_v27 = vld [vmem:[#allocation7 + $0x8] ss:$0 sm:$0xff] }
  0x89   : > { %596 = vst [vmem:[#allocation3 + $0xe1] sm:$0xff] %v564_v28  ;;  %597 = vst [vmem:[#allocation3 + $0xf1] sm:$0xff] %v565_v29  ;;  %v317_v28 = vadd.f32 %v309_v60, %v2019_v59  ;;  %v359_v29 = vmul.f32 %v2022_v61, %v345_v57  ;;  %v311_v46 = vmul.f32 %v2012_v55, %v286_v26 }
  0x8a   : > { %598 = vst [vmem:[#allocation3 + $0xf9] sm:$0xff] %v566_v30  ;;  %599 = vst [vmem:[#allocation3 + $0x109] sm:$0xff] %v567_v31  ;;  %v417_v30 = vld [vmem:[#allocation2 + $0x22] sm:$0xff]  ;;  %v298_v31 = vmul.f32 %v2010_v54, %v284_v52  ;;  %v430_v50 = vmul.f32 %v2029_v25, %v416_v63  ;;  %v361_v57 = vmul.f32 %v2022_v61, %v1898_v2 }
  0x8b   : > { %600 = vst [vmem:[#allocation3 + $0x111] sm:$0xff] %v568_v32  ;;  %601 = vst [vmem:[#allocation3 + $0x121] sm:$0xff] %v569_v33  ;;  %v310_v32 = vmul.f32 %v2012_v55, %v285_v53  ;;  %v379_v33 = vmul.f32 %v2025_v10, %v1895_v1  ;;  %v337_v37 = vadd.f32 %v329_v0, %v317_v28  ;;  %v288_v0 = vld [vmem:[#allocation2 + $0x50] sm:$0xff] }
  0x8c   : > { %602 = vst [vmem:[#allocation3 + $0x129] sm:$0xff] %v570_v34  ;;  %603 = vst [vmem:[#allocation3 + $0x139] sm:$0xff] %v571_v35  ;;  %v399_v34 = vmul.f32 %v2027_v23, %v1898_v2  ;;  %v429_v35 = vmul.f32 %v2029_v25, %v415_v62  ;;  %v469_v42 = vmul.f32 %v2031_v27, %v417_v30 }
  0x8d   : > { %604 = vst [vmem:[#allocation3 + $0x141] sm:$0xff] %v572_v39  ;;  %605 = vst [vmem:[#allocation3 + $0x151] sm:$0xff] %v573_v40  ;;  %v318_v38 = vadd.f32 %v310_v32, %v298_v31  ;;  %v330_v39 = vmul.f32 %v2014_v56, %v286_v26  ;;  %v360_v40 = vmul.f32 %v2022_v61, %v1895_v1  ;;  %v419_v32 = vld [vmem:[#allocation2 + $0x42] sm:$0xff] }
  0x8e   : > { %606 = vst [vmem:[#allocation3 + $0x159] sm:$0xff] %v574_v41  ;;  %607 = vst [vmem:[#allocation3 + $0x169] sm:$0xff] %v575_v43  ;;  %v287_v41 = vld [vmem:[#allocation2 + $0x40] sm:$0xff]  ;;  %v380_v43 = vmul.f32 %v2025_v10, %v1898_v2  ;;  %v450_v1 = vmul.f32 %v2016_v58, %v417_v30  ;;  %v300_v28 = vmul.f32 %v2010_v54, %v286_v26 }
  0x8f   : > { %608 = vst [vmem:[#allocation3 + $0x171] sm:$0xff] %v576_v44  ;;  %609 = vst [vmem:[#allocation3 + $0x181] sm:$0xff] %v577_v45  ;;  %v418_v44 = vld [vmem:[#allocation2 + $0x32] sm:$0xff]  ;;  %v299_v45 = vmul.f32 %v2010_v54, %v285_v53  ;;  %v338_v48 = vadd.f32 %v330_v39, %v318_v38  ;;  %v331_v52 = vmul.f32 %v2014_v56, %v287_v41 }
  0x90   : > { %610 = vst [vmem:[#allocation3 + $0x189] sm:$0xff] %v578_v47  ;;  %v367_v47 = vadd.f32 %v359_v29, %v337_v37  ;;  %v470_v53 = vmul.f32 %v2031_v27, %v418_v44  ;;  %v381_v31 = vmul.f32 %v2025_v10, %v1901_v3  ;;  %v401_v63 = vmul.f32 %v2027_v23, %v1907_v4 }
  0x91   : > { %v319_v51 = vadd.f32 %v311_v46, %v299_v45  ;;  %v368_v62 = vadd.f32 %v360_v40, %v338_v48  ;;  %v312_v37 = vmul.f32 %v2012_v55, %v287_v41  ;;  %v431_v2 = vmul.f32 %v2029_v25, %v417_v30 }
  0x92   : > { %v387_v60 = vadd.f32 %v379_v33, %v367_v47  ;;  %v451_v33 = vmul.f32 %v2016_v58, %v418_v44  ;;  %v332_v26 = vmul.f32 %v2014_v56, %v288_v0  ;;  %v362_v46 = vmul.f32 %v2022_v61, %v1901_v3  ;;  %v289_v47 = vld [vmem:[#allocation2 + $0x60] sm:$0xff] }
  0x93   : > { %v339_v29 = vadd.f32 %v331_v52, %v319_v51  ;;  %v388_v39 = vadd.f32 %v380_v43, %v368_v62  ;;  %v320_v45 = vadd.f32 %v312_v37, %v300_v28  ;;  %v471_v52 = vmul.f32 %v2031_v27, %v419_v32 }
  0x94   : > { %v407_v38 = vadd.f32 %v399_v34, %v387_v60  ;;  %v301_v24 = vmul.f32 %v2010_v54, %v287_v41  ;;  %v382_v30 = vmul.f32 %v2025_v10, %v1907_v4  ;;  %v402_v28 = vmul.f32 %v2027_v23, %v1910_v5 }
  0x95   : > { %v369_v40 = vadd.f32 %v361_v57, %v339_v29  ;;  %v408_v51 = vadd.f32 %v400_v49, %v388_v39  ;;  %v340_v43 = vadd.f32 %v332_v26, %v320_v45  ;;  %v313_v57 = vmul.f32 %v2012_v55, %v288_v0 }
  0x96   : > { %v437_v48 = vadd.f32 %v429_v35, %v407_v38  ;;  %v333_v3 = vmul.f32 %v2014_v56, %v289_v47  ;;  %v2081_v35 = vld [vmem:[%s2976_s2] ss:$0 sm:$0xff]  ;;  %v383_v26 = vmul.f32 %v2025_v10, %v1910_v5 }
  0x97   : > { %v389_v34 = vadd.f32 %v381_v31, %v369_v40  ;;  %v438_v62 = vadd.f32 %v430_v50, %v408_v51  ;;  %v370_v49 = vadd.f32 %v362_v46, %v340_v43  ;;  %v321_v29 = vadd.f32 %v313_v57, %v301_v24  ;;  %v420_v46 = vld [vmem:[#allocation2 + $0x52] sm:$0xff] }
  0x98   : > { %v457_v60 = vadd.f32 %v449_v36, %v437_v48  ;;  %v363_v31 = vmul.f32 %v2022_v61, %v1907_v4  ;;  %v432_v36 = vmul.f32 %v2029_v25, %v418_v44  ;;  %v452_v50 = vmul.f32 %v2016_v58, %v419_v32  ;;  %v290_v48 = vld [vmem:[#allocation2 + $0x70] sm:$0xff] }
  0x99   : > { %v409_v41 = vadd.f32 %v401_v63, %v389_v34  ;;  %v458_v38 = vadd.f32 %v450_v1, %v438_v62  ;;  %v390_v40 = vadd.f32 %v382_v30, %v370_v49  ;;  %v341_v45 = vadd.f32 %v333_v3, %v321_v29  ;;  %v421_v62 = vld [vmem:[#allocation2 + $0x62] sm:$0xff] }
  0x9a   : > { %v477_v37 = vadd.f32 %v469_v42, %v457_v60  ;;  %v302_v4 = vmul.f32 %v2010_v54, %v288_v0  ;;  %v314_v42 = vmul.f32 %v2012_v55, %v289_v47  ;;  %v334_v43 = vmul.f32 %v2014_v56, %v290_v48 }
  0x9b   : > { %v439_v39 = vadd.f32 %v431_v2, %v409_v41  ;;  %v478_v24 = vadd.f32 %v470_v53, %v458_v38  ;;  %v410_v44 = vadd.f32 %v402_v28, %v390_v40  ;;  %v371_v51 = vadd.f32 %v363_v31, %v341_v45 }
  0x9c   : > { %v491_v63 = vadd.f32 %v2081_v35, %v477_v37  ;;  %v403_v2 = vmul.f32 %v2027_v23, %v1913_v6  ;;  %v322_v53 = vadd.f32 %v314_v42, %v302_v4  ;;  %v364_v0 = vmul.f32 %v2022_v61, %v1910_v5 }
  0x9d   : > { %v459_v1 = vadd.f32 %v451_v33, %v439_v39  ;;  %v492_v34 = vadd.f32 %v2081_v35, %v478_v24  ;;  %v440_v30 = vadd.f32 %v432_v36, %v410_v44  ;;  %v472_v57 = vmul.f32 %v2031_v27, %v420_v46  ;;  %v422_v24 = vld [vmem:[#allocation2 + $0x72] sm:$0xff] }
  0x9e   : > { %499 = vst [vmem:[%s2096_s24] sm:$0xff] %v491_v63  ;;  %v391_v60 = vadd.f32 %v383_v26, %v371_v51  ;;  %v433_v28 = vmul.f32 %v2029_v25, %v419_v32  ;;  %v453_v3 = vmul.f32 %v2016_v58, %v420_v46  ;;  %v342_v41 = vadd.f32 %v334_v43, %v322_v53 }
  0x9f   : > { %v479_v33 = vadd.f32 %v471_v52, %v459_v1  ;;  %500 = vst [vmem:[%s2096_s24 + $0x8] sm:$0xff] %v492_v34  ;;  %v384_v49 = vmul.f32 %v2025_v10, %v1913_v6  ;;  %v460_v31 = vadd.f32 %v452_v50, %v440_v30  ;;  %v291_v52 = vld [vmem:[#allocation2 + $0x80] sm:$0xff]  ;;  %v303_v37 = vmul.f32 %v2010_v54, %v289_v47 }
  0xa0   : > { %v411_v5 = vadd.f32 %v403_v2, %v391_v60  ;;  %v473_v38 = vmul.f32 %v2031_v27, %v421_v62  ;;  %v372_v36 = vadd.f32 %v364_v0, %v342_v41  ;;  %v404_v39 = vmul.f32 %v2027_v23, %v1919_v7  ;;  %v423_v30 = vld [vmem:[#allocation2 + $0x82] sm:$0xff]  ;;  %v613_v60 = vld [vmem:[#allocation3 + $0x18] sm:$0xff] }
  0xa1   : > { %v493_v29 = vadd.f32 %v2081_v35, %v479_v33  ;;  %v315_v32 = vmul.f32 %v2012_v55, %v290_v48  ;;  %v480_v40 = vadd.f32 %v472_v57, %v460_v31  ;;  %v434_v26 = vmul.f32 %v2029_v25, %v420_v46  ;;  %v354_v41 = vld [vmem:[#allocation2 + $0x91] sm:$0xff]  ;;  %v807_v31 = vld [vmem:[#allocation3 + $0x1] sm:$0xff] }
  0xa2   : > { %v441_v45 = vadd.f32 %v433_v28, %v411_v5  ;;  %v454_v50 = vmul.f32 %v2016_v58, %v421_v62  ;;  %v392_v63 = vadd.f32 %v384_v49, %v372_v36  ;;  %v335_v47 = vmul.f32 %v2014_v56, %v291_v52 }
  0xa3   : > { %501 = vst [vmem:[%s2096_s24 + $0x10] sm:$0xff] %v493_v29  ;;  %v323_v4 = vadd.f32 %v315_v32, %v303_v37  ;;  %v365_v42 = vmul.f32 %v2022_v61, %v1913_v6  ;;  %v494_v1 = vadd.f32 %v2081_v35, %v480_v40  ;;  %v385_v51 = vmul.f32 %v2025_v10, %v1919_v7  ;;  %v2134_v29 = vld [vmem:[#allocation3 + $0x30] sm:$0xff]  ;;  %v2141_v32 = vld [vmem:[#allocation3 + $0x20] sm:$0xff] }
  0xa4   : > { %v461_v44 = vadd.f32 %v453_v3, %v441_v45  ;;  %v304_v2 = vmul.f32 %v2010_v54, %v290_v48  ;;  %v412_v34 = vadd.f32 %v404_v39, %v392_v63  ;;  %v316_v53 = vmul.f32 %v2012_v55, %v291_v52 }
  0xa5   : > { %v343_v46 = vadd.f32 %v335_v47, %v323_v4  ;;  %v336_v43 = vmul.f32 0.0, %v2014_v56  ;;  %502 = vst [vmem:[%s2096_s24 + $0x18] sm:$0xff] %v494_v1  ;;  %v474_v33 = vmul.f32 %v2031_v27, %v422_v24  ;;  %v405_v6 = vmul.f32 %v2027_v23, %v1922_v8  ;;  %v808_v1 = vld [vmem:[#allocation3 + $0x9] sm:$0xff] }
  0xa6   : > { %v481_v0 = vadd.f32 %v473_v38, %v461_v44  ;;  %v435_v57 = vmul.f32 %v2029_v25, %v421_v62  ;;  %v442_v28 = vadd.f32 %v434_v26, %v412_v34  ;;  %v324_v3 = vadd.f32 %v316_v53, %v304_v2 }
  0xa7   : > { %v373_v48 = vadd.f32 %v365_v42, %v343_v46  ;;  %v366_v49 = vmul.f32 %v2022_v61, %v1919_v7  ;;  %v455_v52 = vmul.f32 %v2016_v58, %v422_v24  ;;  %v386_v37 = vmul.f32 %v2025_v10, %v1922_v8  ;;  %v2150_v42 = vld [vmem:[#allocation3 + $0x38] sm:$0xff] }
  0xa8   : > { %v495_v5 = vadd.f32 %v2081_v35, %v481_v0  ;;  %v462_v62 = vadd.f32 %v454_v50, %v442_v28  ;;  %v344_v36 = vadd.f32 %v336_v43, %v324_v3  ;;  %v679_v39 = vmul.f32 %v613_v60, %v2012_v55  ;;  %v424_v50 = vld [vmem:[#allocation2 + $0x92] sm:$0xff] }
  0xa9   : > { %v393_v38 = vadd.f32 %v385_v51, %v373_v48  ;;  %v475_v7 = vmul.f32 %v2031_v27, %v423_v30  ;;  %v406_v40 = vmul.f32 %v2027_v23, %v354_v41  ;;  %v743_v45 = vmul.f32 %v2134_v29, %v2014_v56 }
  0xaa   : > { %503 = vst [vmem:[%s2096_s24 + $0x20] sm:$0xff] %v495_v5  ;;  %v843_v26 = vmul.f32 %v807_v31, %v2022_v61  ;;  %v482_v63 = vadd.f32 %v474_v33, %v462_v62  ;;  %v374_v8 = vadd.f32 %v366_v49, %v344_v36  ;;  %v711_v47 = vadd.f32 %v679_v39, %v2019_v59  ;;  %v1035_v33 = vld [vmem:[#allocation3 + $0x2] sm:$0xff]  ;;  %v2169_v31 = vld [vmem:[#allocation3 + $0x32] sm:$0xff] }
  0xab   : > { %v413_v4 = vadd.f32 %v405_v6, %v393_v38  ;;  %v436_v44 = vmul.f32 %v2029_v25, %v422_v24  ;;  %v456_v51 = vmul.f32 %v2016_v58, %v423_v30  ;;  %v907_v2 = vmul.f32 %v1925_v9, %v2025_v10  ;;  %v2159_v6 = vld [vmem:[#allocation3 + $0x1a] sm:$0xff]  ;;  %v1036_v38 = vld [vmem:[#allocation3 + $0xa] sm:$0xff] }
  0xac   : > { %v680_v34 = vmul.f32 %v2141_v32, %v2012_v55  ;;  %v496_v46 = vadd.f32 %v2081_v35, %v482_v63  ;;  %v394_v43 = vadd.f32 %v386_v37, %v374_v8  ;;  %v775_v0 = vadd.f32 %v743_v45, %v711_v47  ;;  %v2183_v8 = vld [vmem:[#allocation3 + $0x22] sm:$0xff] }
  0xad   : > { %v443_v53 = vadd.f32 %v435_v57, %v413_v4  ;;  %v476_v28 = vmul.f32 %v2031_v27, %v424_v50  ;;  %v744_v30 = vmul.f32 %v2150_v42, %v2014_v56  ;;  %v844_v48 = vmul.f32 %v808_v1, %v2022_v61 }
  0xae   : > { %v712_v24 = vadd.f32 %v680_v34, %v2019_v59  ;;  %504 = vst [vmem:[%s2096_s24 + $0x28] sm:$0xff] %v496_v46  ;;  %v414_v41 = vadd.f32 %v406_v40, %v394_v43  ;;  %v875_v49 = vadd.f32 %v843_v26, %v775_v0  ;;  %v971_v57 = vmul.f32 %v1934_v12, %v2027_v23  ;;  %v2176_v40 = vld [vmem:[#allocation3 + $0x48] sm:$0xff] }
  0xaf   : > { %v463_v3 = vadd.f32 %v455_v52, %v443_v53  ;;  %v1071_v5 = vmul.f32 %v1035_v33, %v2029_v25  ;;  %v1135_v37 = vmul.f32 %v2159_v6, %v2016_v58  ;;  %v908_v62 = vmul.f32 %v1931_v11, %v2025_v10  ;;  %v2193_v53 = vld [vmem:[#allocation3 + $0x50] sm:$0xff] }
  0xb0   : > { %v776_v59 = vadd.f32 %v744_v30, %v712_v24  ;;  %v444_v39 = vadd.f32 %v436_v44, %v414_v41  ;;  %v939_v52 = vadd.f32 %v907_v2, %v875_v49  ;;  %v649_v45 = vmul.f32 %v613_v60, %v2010_v54  ;;  %v2200_v30 = vld [vmem:[#allocation3 + $0x3a] sm:$0xff] }
  0xb1   : > { %v483_v36 = vadd.f32 %v475_v7, %v463_v3  ;;  %v1199_v26 = vmul.f32 %v2031_v27, %v2169_v31  ;;  %v972_v4 = vmul.f32 %v1937_v13, %v2027_v23  ;;  %v681_v50 = vmul.f32 %v2134_v29, %v2012_v55 }
  0xb2   : > { %v876_v63 = vadd.f32 %v844_v48, %v776_v59  ;;  %v464_v47 = vadd.f32 %v456_v51, %v444_v39  ;;  %v1003_v1 = vadd.f32 %v971_v57, %v939_v52  ;;  %v1072_v44 = vmul.f32 %v1036_v38, %v2029_v25 }
  0xb3   : > { %v497_v7 = vadd.f32 %v2081_v35, %v483_v36  ;;  %v713_v60 = vadd.f32 %v681_v50, %v649_v45  ;;  %v745_v34 = vmul.f32 %v2176_v40, %v2014_v56  ;;  %v845_v46 = vmul.f32 %v1925_v9, %v2022_v61  ;;  %v2221_v50 = vld [vmem:[#allocation3 + $0x4a] sm:$0xff] }
  0xb4   : > { %v940_v2 = vadd.f32 %v908_v62, %v876_v63  ;;  %v484_v43 = vadd.f32 %v476_v28, %v464_v47  ;;  %v1103_v0 = vadd.f32 %v1071_v5, %v1003_v1  ;;  %v1136_v51 = vmul.f32 %v2183_v8, %v2016_v58  ;;  %v2218_v63 = vld [vmem:[#allocation3 + $0x60] sm:$0xff] }
  0xb5   : > { %505 = vst [vmem:[%s2096_s24 + $0x30] sm:$0xff] %v497_v7  ;;  %v909_v33 = vmul.f32 %v1934_v12, %v2025_v10  ;;  %v777_v48 = vadd.f32 %v745_v34, %v713_v60  ;;  %v650_v3 = vmul.f32 %v2141_v32, %v2010_v54  ;;  %v682_v9 = vmul.f32 %v2150_v42, %v2012_v55 }
  0xb6   : > { %v1004_v24 = vadd.f32 %v972_v4, %v940_v2  ;;  %v498_v28 = vadd.f32 %v2081_v35, %v484_v43  ;;  %v1167_v41 = vadd.f32 %v1135_v37, %v1103_v0  ;;  %v973_v49 = vmul.f32 %v1943_v14, %v2027_v23 }
  0xb7   : > { %v746_v57 = vmul.f32 %v2193_v53, %v2014_v56  ;;  %v877_v59 = vadd.f32 %v845_v46, %v777_v48  ;;  %v714_v62 = vadd.f32 %v682_v9, %v650_v3  ;;  %v846_v38 = vmul.f32 %v1931_v11, %v2022_v61 }
  0xb8   : > { %v1104_v5 = vadd.f32 %v1072_v44, %v1004_v24  ;;  %506 = vst [vmem:[%s2096_s24 + $0x38] sm:$0xff] %v498_v28  ;;  %v1231_v32 = vadd.f32 %v1199_v26, %v1167_v41  ;;  %v1200_v36 = vmul.f32 %v2031_v27, %v2200_v30  ;;  %v910_v45 = vmul.f32 %v1937_v13, %v2025_v10  ;;  %v2243_v24 = vld [vmem:[#allocation3 + $0x52] sm:$0xff] }
  0xb9   : > { %v941_v37 = vadd.f32 %v909_v33, %v877_v59  ;;  %v778_v52 = vadd.f32 %v746_v57, %v714_v62  ;;  %v1073_v11 = vmul.f32 %v2159_v6, %v2029_v25  ;;  %v651_v26 = vmul.f32 %v2134_v29, %v2010_v54  ;;  %v2241_v33 = vld [vmem:[#allocation3 + $0x68] sm:$0xff] }
  0xba   : > { %v1168_v39 = vadd.f32 %v1136_v51, %v1104_v5  ;;  %v1263_v4 = vadd.f32 %v2081_v35, %v1231_v32  ;;  %v683_v7 = vmul.f32 %v2176_v40, %v2012_v55  ;;  %v974_v2 = vmul.f32 %v1946_v15, %v2027_v23 }
  0xbb   : > { %v1005_v1 = vadd.f32 %v973_v49, %v941_v37  ;;  %v878_v44 = vadd.f32 %v846_v38, %v778_v52  ;;  %v1137_v60 = vmul.f32 %v2169_v31, %v2016_v58  ;;  %v747_v6 = vmul.f32 %v2218_v63, %v2014_v56 }
  0xbc   : > { %v1232_v47 = vadd.f32 %v1200_v36, %v1168_v39  ;;  %1295 = vst [vmem:[%s2096_s24 + $0x40] sm:$0xff] %v1263_v4  ;;  %v715_v34 = vadd.f32 %v683_v7, %v651_v26  ;;  %v847_v29 = vmul.f32 %v1934_v12, %v2022_v61  ;;  %v1201_v0 = vmul.f32 %v2031_v27, %v2221_v50  ;;  %v2271_v26 = vld [vmem:[#allocation3 + $0x62] sm:$0xff] }
  0xbd   : > { %v1105_v43 = vadd.f32 %v1073_v11, %v1005_v1  ;;  %v942_v51 = vadd.f32 %v910_v45, %v878_v44  ;;  %v911_v3 = vmul.f32 %v1943_v14, %v2025_v10  ;;  %v652_v9 = vmul.f32 %v2150_v42, %v2010_v54  ;;  %v2266_v45 = vld [vmem:[#allocation3 + $0x78] sm:$0xff] }
  0xbe   : > { %v1264_v46 = vadd.f32 %v2081_v35, %v1232_v47  ;;  %v779_v48 = vadd.f32 %v747_v6, %v715_v34  ;;  %v684_v12 = vmul.f32 %v2193_v53, %v2012_v55  ;;  %v1074_v49 = vmul.f32 %v2183_v8, %v2029_v25 }
  0xbf   : > { %v1169_v28 = vadd.f32 %v1137_v60, %v1105_v43  ;;  %v1006_v41 = vadd.f32 %v974_v2, %v942_v51  ;;  %v975_v57 = vmul.f32 %v1949_v16, %v2027_v23  ;;  %v748_v62 = vmul.f32 %v2241_v33, %v2014_v56  ;;  %v2290_v51 = vld [vmem:[#allocation3 + $0x80] sm:$0xff] }
  0xc0   : > { %1296 = vst [vmem:[%s2096_s24 + $0x48] sm:$0xff] %v1264_v46  ;;  %v879_v5 = vadd.f32 %v847_v29, %v779_v48  ;;  %v716_v59 = vadd.f32 %v684_v12, %v652_v9  ;;  %v848_v42 = vmul.f32 %v1937_v13, %v2022_v61  ;;  %v1138_v36 = vmul.f32 %v2200_v30, %v2016_v58 }
  0xc1   : > { %v1233_v38 = vadd.f32 %v1201_v0, %v1169_v28  ;;  %v1106_v32 = vadd.f32 %v1074_v49, %v1006_v41  ;;  %v1202_v8 = vmul.f32 %v2031_v27, %v2243_v24  ;;  %v912_v52 = vmul.f32 %v1946_v15, %v2025_v10 }
  0xc2   : > { %v943_v39 = vadd.f32 %v911_v3, %v879_v5  ;;  %v780_v37 = vadd.f32 %v748_v62, %v716_v59  ;;  %v653_v4 = vmul.f32 %v2176_v40, %v2010_v54  ;;  %v1075_v7 = vmul.f32 %v2169_v31, %v2029_v25  ;;  %v2293_v3 = vld [vmem:[#allocation3 + $0x6a] sm:$0xff] }
  0xc3   : > { %v1265_v13 = vadd.f32 %v2081_v35, %v1233_v38  ;;  %v1170_v11 = vadd.f32 %v1138_v36, %v1106_v32  ;;  %v685_v47 = vmul.f32 %v2218_v63, %v2012_v55  ;;  %v1139_v44 = vmul.f32 %v2221_v50, %v2016_v58 }
  0xc4   : > { %v1007_v1 = vadd.f32 %v975_v57, %v943_v39  ;;  %v880_v2 = vadd.f32 %v848_v42, %v780_v37  ;;  %v976_v60 = vmul.f32 %v1955_v17, %v2027_v23  ;;  %v749_v6 = vmul.f32 %v2266_v45, %v2014_v56  ;;  %v2314_v37 = vld [vmem:[#allocation3 + $0x90] sm:$0xff] }
  0xc5   : > { %1297 = vst [vmem:[%s2096_s24 + $0x50] sm:$0xff] %v1265_v13  ;;  %v1234_v40 = vadd.f32 %v1202_v8, %v1170_v11  ;;  %v717_v34 = vadd.f32 %v685_v47, %v653_v4  ;;  %v849_v31 = vmul.f32 %v1943_v14, %v2022_v61  ;;  %v1203_v46 = vmul.f32 %v2031_v27, %v2271_v26  ;;  %v2319_v13 = vld [vmem:[#allocation3 + $0x7a] sm:$0xff] }
  0xc6   : > { %v1107_v29 = vadd.f32 %v1075_v7, %v1007_v1  ;;  %v944_v43 = vadd.f32 %v912_v52, %v880_v2  ;;  %v913_v0 = vmul.f32 %v1949_v16, %v2025_v10  ;;  %v654_v12 = vmul.f32 %v2193_v53, %v2010_v54 }
  0xc7   : > { %v1266_v48 = vadd.f32 %v2081_v35, %v1234_v40  ;;  %v781_v9 = vadd.f32 %v749_v6, %v717_v34  ;;  %v686_v14 = vmul.f32 %v2241_v33, %v2012_v55  ;;  %v1076_v49 = vmul.f32 %v2200_v30, %v2029_v25 }
  0xc8   : > { %v1171_v28 = vadd.f32 %v1139_v44, %v1107_v29  ;;  %v1008_v41 = vadd.f32 %v976_v60, %v944_v43  ;;  %v977_v57 = vmul.f32 %v1958_v18, %v2027_v23  ;;  %v750_v62 = vmul.f32 %v2290_v51, %v2014_v56 }
  0xc9   : > { %1298 = vst [vmem:[%s2096_s24 + $0x58] sm:$0xff] %v1266_v48  ;;  %v881_v5 = vadd.f32 %v849_v31, %v781_v9  ;;  %v718_v59 = vadd.f32 %v686_v14, %v654_v12  ;;  %v850_v53 = vmul.f32 %v1946_v15, %v2022_v61  ;;  %v1140_v32 = vmul.f32 %v2243_v24, %v2016_v58 }
  0xca   : > { %v1235_v42 = vadd.f32 %v1203_v46, %v1171_v28  ;;  %v1108_v38 = vadd.f32 %v1076_v49, %v1008_v41  ;;  %v1204_v30 = vmul.f32 %v2031_v27, %v2293_v3  ;;  %v914_v39 = vmul.f32 %v1955_v17, %v2025_v10  ;;  %v2338_v46 = vld [vmem:[#allocation3 + $0x98] sm:$0xff] }
  0xcb   : > { %v945_v36 = vadd.f32 %v913_v0, %v881_v5  ;;  %v782_v8 = vadd.f32 %v750_v62, %v718_v59  ;;  %v655_v52 = vmul.f32 %v2218_v63, %v2010_v54  ;;  %v1077_v11 = vmul.f32 %v2221_v50, %v2029_v25  ;;  %v2341_v0 = vld [vmem:[#allocation3 + $0x82] sm:$0xff] }
  0xcc   : > { %v1267_v15 = vadd.f32 %v2081_v35, %v1235_v42  ;;  %v1172_v4 = vadd.f32 %v1140_v32, %v1108_v38  ;;  %v687_v7 = vmul.f32 %v2266_v45, %v2012_v55  ;;  %v1141_v1 = vmul.f32 %v2271_v26, %v2016_v58 }
  0xcd   : > { %v1009_v47 = vadd.f32 %v977_v57, %v945_v36  ;;  %v882_v44 = vadd.f32 %v850_v53, %v782_v8  ;;  %v978_v2 = vmul.f32 %v1961_v19, %v2027_v23  ;;  %v751_v40 = vmul.f32 %v2314_v37, %v2014_v56 }
  0xce   : > { %1299 = vst [vmem:[%s2096_s24 + $0x60] sm:$0xff] %v1267_v15  ;;  %v1236_v63 = vadd.f32 %v1204_v30, %v1172_v4  ;;  %v719_v60 = vadd.f32 %v687_v7, %v655_v52  ;;  %v851_v50 = vmul.f32 %v1949_v16, %v2022_v61  ;;  %v1205_v6 = vmul.f32 %v2031_v27, %v2319_v13  ;;  %v2362_v30 = vld [vmem:[#allocation3 + $0xa8] sm:$0xff] }
  0xcf   : > { %v1109_v34 = vadd.f32 %v1077_v11, %v1009_v47  ;;  %v946_v31 = vadd.f32 %v914_v39, %v882_v44  ;;  %v915_v29 = vmul.f32 %v1958_v18, %v2025_v10  ;;  %v656_v9 = vmul.f32 %v2241_v33, %v2010_v54  ;;  %v2367_v39 = vld [vmem:[#allocation3 + $0x92] sm:$0xff] }
  0xd0   : > { %v1268_v43 = vadd.f32 %v2081_v35, %v1236_v63  ;;  %v783_v48 = vadd.f32 %v751_v40, %v719_v60  ;;  %v688_v16 = vmul.f32 %v2290_v51, %v2012_v55  ;;  %v1078_v28 = vmul.f32 %v2243_v24, %v2029_v25 }
  0xd1   : > { %v1173_v12 = vadd.f32 %v1141_v1, %v1109_v34  ;;  %v1010_v14 = vadd.f32 %v978_v2, %v946_v31  ;;  %v979_v41 = vmul.f32 %v1967_v20, %v2027_v23  ;;  %v752_v5 = vmul.f32 %v2338_v46, %v2014_v56 }
  0xd2   : > { %1300 = vst [vmem:[%s2096_s24 + $0x68] sm:$0xff] %v1268_v43  ;;  %v883_v49 = vadd.f32 %v851_v50, %v783_v48  ;;  %v720_v57 = vadd.f32 %v688_v16, %v656_v9  ;;  %v852_v33 = vmul.f32 %v1955_v17, %v2022_v61  ;;  %v1142_v53 = vmul.f32 %v2293_v3, %v2016_v58  ;;  %v2386_v50 = vld [vmem:[#allocation3 + $0xb0] sm:$0xff]  ;;  %v2398_v16 = vld [vmem:[#allocation3 + $0x9a] sm:$0xff] }
  0xd3   : > { %v1237_v59 = vadd.f32 %v1205_v6, %v1173_v12  ;;  %v1110_v62 = vadd.f32 %v1078_v28, %v1010_v14  ;;  %v1206_v24 = vmul.f32 %v2031_v27, %v2341_v0  ;;  %v916_v32 = vmul.f32 %v1961_v19, %v2025_v10 }
  0xd4   : > { %v947_v42 = vadd.f32 %v915_v29, %v883_v49  ;;  %v784_v38 = vadd.f32 %v752_v5, %v720_v57  ;;  %v657_v36 = vmul.f32 %v2266_v45, %v2010_v54  ;;  %v1079_v52 = vmul.f32 %v2271_v26, %v2029_v25 }
  0xd5   : > { %v1269_v17 = vadd.f32 %v2081_v35, %v1237_v59  ;;  %v1174_v8 = vadd.f32 %v1142_v53, %v1110_v62  ;;  %v689_v15 = vmul.f32 %v2314_v37, %v2012_v55  ;;  %v1143_v11 = vmul.f32 %v2319_v13, %v2016_v58  ;;  %v2408_v59 = vld [vmem:[#allocation3 + $0xc0] sm:$0xff] }
  0xd6   : > { %v1011_v4 = vadd.f32 %v979_v41, %v947_v42  ;;  %v884_v7 = vadd.f32 %v852_v33, %v784_v38  ;;  %v980_v47 = vmul.f32 %v1970_v21, %v2027_v23  ;;  %v753_v44 = vmul.f32 %v2362_v30, %v2014_v56 }
  0xd7   : > { %1301 = vst [vmem:[%s2096_s24 + $0x70] sm:$0xff] %v1269_v17  ;;  %v1238_v45 = vadd.f32 %v1206_v24, %v1174_v8  ;;  %v721_v1 = vadd.f32 %v689_v15, %v657_v36  ;;  %v853_v26 = vmul.f32 %v1958_v18, %v2022_v61  ;;  %v1207_v63 = vmul.f32 %v2031_v27, %v2367_v39  ;;  %v2997_v17 = vld [vmem:[#allocation13_spill] sm:$0xff] }
  0xd8   : > { %v1111_v2 = vadd.f32 %v1079_v52, %v1011_v4  ;;  %v948_v60 = vadd.f32 %v916_v32, %v884_v7  ;;  %v917_v40 = vmul.f32 %v1967_v20, %v2025_v10  ;;  %v658_v31 = vmul.f32 %v2290_v51, %v2010_v54 }
  0xd9   : > { %v1270_v34 = vadd.f32 %v2081_v35, %v1238_v45  ;;  %v785_v6 = vadd.f32 %v753_v44, %v721_v1  ;;  %v690_v29 = vmul.f32 %v2338_v46, %v2012_v55  ;;  %v1080_v48 = vmul.f32 %v2293_v3, %v2029_v25  ;;  %v2432_v1 = vld [vmem:[#allocation3 + $0xc8] sm:$0xff] }
  0xda   : > { %v1175_v18 = vadd.f32 %v1143_v11, %v1111_v2  ;;  %v1012_v43 = vadd.f32 %v980_v47, %v948_v60  ;;  %v981_v9 = vmul.f32 %v1973_v22, %v2027_v23  ;;  %v754_v28 = vmul.f32 %v2386_v50, %v2014_v56  ;;  %v2435_v2 = vld [vmem:[#allocation3 + $0xc1] sm:$0xff] }
  0xdb   : > { %1302 = vst [vmem:[%s2096_s24 + $0x78] sm:$0xff] %v1270_v34  ;;  %v885_v12 = vadd.f32 %v853_v26, %v785_v6  ;;  %v722_v14 = vadd.f32 %v690_v29, %v658_v31  ;;  %v854_v51 = vmul.f32 %v1961_v19, %v2022_v61  ;;  %v1144_v3 = vmul.f32 %v2341_v0, %v2016_v58  ;;  %v2446_v6 = vld [vmem:[#allocation3 + $0xb2] sm:$0xff] }
  0xdc   : > { %v1239_v41 = vadd.f32 %v1207_v63, %v1175_v18  ;;  %v1112_v49 = vadd.f32 %v1080_v48, %v1012_v43  ;;  %v918_v33 = vmul.f32 %v1970_v21, %v2025_v10  ;;  %v659_v62 = vmul.f32 %v2314_v37, %v2010_v54  ;;  %v2422_v37 = vld [vmem:[#allocation3 + $0xaa] sm:$0xff] }
  0xdd   : > { %v949_v57 = vadd.f32 %v917_v40, %v885_v12  ;;  %v786_v5 = vadd.f32 %v754_v28, %v722_v14  ;;  %v1208_v19 = vmul.f32 %v2031_v27, %v2398_v16  ;;  %v691_v42 = vmul.f32 %v2362_v30, %v2012_v55 }
  0xde   : > { %v1271_v53 = vadd.f32 %v2081_v35, %v1239_v41  ;;  %v1176_v24 = vadd.f32 %v1144_v3, %v1112_v49  ;;  %v1081_v32 = vmul.f32 %v2319_v13, %v2029_v25  ;;  %v982_v8 = vmul.f32 %v2997_v17, %v2027_v23 }
  0xdf   : > { %v1013_v38 = vadd.f32 %v981_v9, %v949_v57  ;;  %v886_v36 = vadd.f32 %v854_v51, %v786_v5  ;;  %v723_v15 = vadd.f32 %v691_v42, %v659_v62  ;;  %v755_v4 = vmul.f32 %v2408_v59, %v2014_v56  ;;  %v2458_v51 = vld [vmem:[#allocation3 + $0xd8] sm:$0xff]  ;;  %v2465_v57 = vld [vmem:[#allocation3 + $0xc2] sm:$0xff] }
  0xe0   : > { %1303 = vst [vmem:[%s2096_s24 + $0x80] sm:$0xff] %v1271_v53  ;;  %v1240_v52 = vadd.f32 %v1208_v19, %v1176_v24  ;;  %v855_v11 = vmul.f32 %v1967_v20, %v2022_v61  ;;  %v1145_v13 = vmul.f32 %v2367_v39, %v2016_v58  ;;  %v919_v45 = vmul.f32 %v1973_v22, %v2025_v10  ;;  %v2467_v5 = vld [vmem:[#allocation3 + $0xc9] sm:$0xff] }
  0xe1   : > { %v1113_v7 = vadd.f32 %v1081_v32, %v1013_v38  ;;  %v950_v47 = vadd.f32 %v918_v33, %v886_v36  ;;  %v787_v26 = vadd.f32 %v755_v4, %v723_v15  ;;  %v660_v63 = vmul.f32 %v2338_v46, %v2010_v54  ;;  %v1547_v32 = vld [vmem:[#allocation3 + $0xa9] sm:$0xff]  ;;  %v2483_v15 = vld [vmem:[#allocation3 + $0xe0] sm:$0xff] }
  0xe2   : > { %v1272_v44 = vadd.f32 %v2081_v35, %v1240_v52  ;;  %v692_v20 = vmul.f32 %v2386_v50, %v2012_v55  ;;  %v1209_v40 = vmul.f32 %v2031_v27, %v2422_v37  ;;  %v1082_v22 = vmul.f32 %v2341_v0, %v2029_v25 }
  0xe3   : > { %v1177_v60 = vadd.f32 %v1145_v13, %v1113_v7  ;;  %v1014_v34 = vadd.f32 %v982_v8, %v950_v47  ;;  %v887_v31 = vadd.f32 %v855_v11, %v787_v26  ;;  %v756_v18 = vmul.f32 %v2432_v1, %v2014_v56  ;;  %v2486_v11 = vld [vmem:[#allocation3 + $0xca] sm:$0xff] }
  0xe4   : > { %1304 = vst [vmem:[%s2096_s24 + $0x88] sm:$0xff] %v1272_v44  ;;  %v724_v29 = vadd.f32 %v692_v20, %v660_v63  ;;  %v856_v46 = vmul.f32 %v1970_v21, %v2022_v61  ;;  %v1146_v9 = vmul.f32 %v2398_v16, %v2016_v58  ;;  %v983_v12 = vmul.f32 %v2435_v2, %v2027_v23  ;;  %v2494_v63 = vld [vmem:[#allocation3 + $0xd9] sm:$0xff] }
  0xe5   : > { %v1241_v43 = vadd.f32 %v1209_v40, %v1177_v60  ;;  %v1114_v48 = vadd.f32 %v1082_v22, %v1014_v34  ;;  %v951_v0 = vadd.f32 %v919_v45, %v887_v31  ;;  %v920_v28 = vmul.f32 %v2997_v17, %v2025_v10 }
  0xe6   : > { %v788_v14 = vadd.f32 %v756_v18, %v724_v29  ;;  %v661_v41 = vmul.f32 %v2362_v30, %v2010_v54  ;;  %v1210_v3 = vmul.f32 %v2031_v27, %v2446_v6  ;;  %v693_v33 = vmul.f32 %v2408_v59, %v2012_v55 }
  0xe7   : > { %v1273_v21 = vadd.f32 %v2081_v35, %v1241_v43  ;;  %v1178_v49 = vadd.f32 %v1146_v9, %v1114_v48  ;;  %v1015_v62 = vadd.f32 %v983_v12, %v951_v0  ;;  %v1083_v53 = vmul.f32 %v2367_v39, %v2029_v25  ;;  %v2508_v48 = vld [vmem:[#allocation3 + $0xda] sm:$0xff]  ;;  %v2510_v12 = vld [vmem:[#allocation3 + $0xf0] sm:$0xff] }
  0xe8   : > { %v1147_v30 = vmul.f32 %v2422_v37, %v2016_v58  ;;  %v888_v24 = vadd.f32 %v856_v46, %v788_v14  ;;  %v725_v42 = vadd.f32 %v693_v33, %v661_v41  ;;  %v757_v38 = vmul.f32 %v2458_v51, %v2014_v56 }
  0xe9   : > { %1305 = vst [vmem:[%s2096_s24 + $0x90] sm:$0xff] %v1273_v21  ;;  %v1242_v19 = vadd.f32 %v1210_v3, %v1178_v49  ;;  %v857_v36 = vmul.f32 %v1547_v32, %v2022_v61  ;;  %v1115_v17 = vadd.f32 %v1083_v53, %v1015_v62  ;;  %v1211_v8 = vmul.f32 %v2031_v27, %v2465_v57  ;;  %v2517_v21 = vld [vmem:[#allocation3 + $0xe1] sm:$0xff] }
  0xea   : > { %v952_v52 = vadd.f32 %v920_v28, %v888_v24  ;;  %v984_v39 = vmul.f32 %v2467_v5, %v2027_v23  ;;  %v789_v7 = vadd.f32 %v757_v38, %v725_v42  ;;  %v662_v13 = vmul.f32 %v2386_v50, %v2010_v54  ;;  %v1548_v50 = vld [vmem:[#allocation3 + $0xb1] sm:$0xff] }
  0xeb   : > { %v1274_v4 = vadd.f32 %v2081_v35, %v1242_v19  ;;  %v694_v47 = vmul.f32 %v2432_v1, %v2012_v55  ;;  %v1179_v45 = vadd.f32 %v1147_v30, %v1115_v17  ;;  %v1084_v26 = vmul.f32 %v2398_v16, %v2029_v25 }
  0xec   : > { %v1016_v44 = vadd.f32 %v984_v39, %v952_v52  ;;  %v921_v20 = vmul.f32 %v2435_v2, %v2025_v10  ;;  %v889_v60 = vadd.f32 %v857_v36, %v789_v7  ;;  %v758_v34 = vmul.f32 %v2483_v15, %v2014_v56  ;;  %v2534_v36 = vld [vmem:[#allocation3 + $0xf8] sm:$0xff] }
  0xed   : > { %1306 = vst [vmem:[%s2096_s24 + $0x98] sm:$0xff] %v1274_v4  ;;  %v726_v40 = vadd.f32 %v694_v47, %v662_v13  ;;  %v858_v22 = vmul.f32 %v1548_v50, %v2022_v61  ;;  %v1243_v31 = vadd.f32 %v1211_v8, %v1179_v45  ;;  %v1148_v18 = vmul.f32 %v2446_v6, %v2016_v58  ;;  %v2537_v8 = vld [vmem:[#allocation3 + $0xe2] sm:$0xff]  ;;  %v2539_v52 = vld [vmem:[#allocation3 + $0xf1] sm:$0xff] }
  0xee   : > { %v1116_v29 = vadd.f32 %v1084_v26, %v1016_v44  ;;  %v1212_v16 = vmul.f32 %v2031_v27, %v2486_v11  ;;  %v953_v46 = vadd.f32 %v921_v20, %v889_v60  ;;  %v985_v43 = vmul.f32 %v2494_v63, %v2027_v23 }
  0xef   : > { %v790_v9 = vadd.f32 %v758_v34, %v726_v40  ;;  %v663_v0 = vmul.f32 %v2408_v59, %v2010_v54  ;;  %v1275_v14 = vadd.f32 %v2081_v35, %v1243_v31  ;;  %v1085_v41 = vmul.f32 %v2422_v37, %v2029_v25  ;;  %v2554_v40 = vld [vmem:[#allocation7 + $0x8] ss:$0 sm:$0xff] }
  0xf0   : > { %v1180_v28 = vadd.f32 %v1148_v18, %v1116_v29  ;;  %v695_v49 = vmul.f32 %v2458_v51, %v2012_v55  ;;  %v1017_v3 = vadd.f32 %v985_v43, %v953_v46  ;;  %v1149_v33 = vmul.f32 %v2465_v57, %v2016_v58  ;;  %v2564_v18 = vld [vmem:[#allocation3 + $0x108] sm:$0xff] }
  0xf1   : > { %v890_v62 = vadd.f32 %v858_v22, %v790_v9  ;;  %v922_v53 = vmul.f32 %v2467_v5, %v2025_v10  ;;  %1307 = vst [vmem:[%s2096_s24 + $0xa0] sm:$0xff] %v1275_v14  ;;  %v1213_v30 = vmul.f32 %v2031_v27, %v2508_v48  ;;  %v759_v37 = vmul.f32 %v2510_v12, %v2014_v56  ;;  %v2560_v22 = vld [vmem:[#allocation3 + $0xf2] sm:$0xff] }
  0xf2   : > { %v1244_v59 = vadd.f32 %v1212_v16, %v1180_v28  ;;  %v727_v24 = vadd.f32 %v695_v49, %v663_v0  ;;  %v1117_v19 = vadd.f32 %v1085_v41, %v1017_v3  ;;  %v986_v38 = vmul.f32 %v2517_v21, %v2027_v23  ;;  %v2571_v0 = vld [vmem:[#allocation3 + $0xf9] sm:$0xff] }
  0xf3   : > { %v954_v42 = vadd.f32 %v922_v53, %v890_v62  ;;  %v859_v32 = vmul.f32 %v2435_v2, %v2022_v61  ;;  %v664_v39 = vmul.f32 %v2432_v1, %v2010_v54  ;;  %v696_v4 = vmul.f32 %v2483_v15, %v2012_v55 }
  0xf4   : > { %v1276_v17 = vadd.f32 %v2081_v35, %v1244_v59  ;;  %v791_v27 = vadd.f32 %v759_v37, %v727_v24  ;;  %v1181_v7 = vadd.f32 %v1149_v33, %v1117_v19  ;;  %v1086_v2 = vmul.f32 %v2446_v6, %v2029_v25  ;;  %v2588_v24 = vld [vmem:[#allocation3 + $0x110] sm:$0xff]  ;;  %v2591_v19 = vld [vmem:[#allocation3 + $0xfa] sm:$0xff] }
  0xf5   : > { %v1018_v13 = vadd.f32 %v986_v38, %v954_v42  ;;  %v1150_v47 = vmul.f32 %v2486_v11, %v2016_v58  ;;  %v923_v44 = vmul.f32 %v2494_v63, %v2025_v10  ;;  %v728_v26 = vadd.f32 %v696_v4, %v664_v39  ;;  %v2593_v38 = vld [vmem:[#allocation3 + $0x109] sm:$0xff] }
  0xf6   : > { %1308 = vst [vmem:[%s2096_s24 + $0xa8] sm:$0xff] %v1276_v17  ;;  %v891_v45 = vadd.f32 %v859_v32, %v791_v27  ;;  %v760_v1 = vmul.f32 %v2534_v36, %v2014_v56  ;;  %v1245_v20 = vadd.f32 %v1213_v30, %v1181_v7  ;;  %v1214_v34 = vmul.f32 %v2554_v40, %v2537_v8 }
  0xf7   : > { %v1118_v60 = vadd.f32 %v1086_v2, %v1018_v13  ;;  %v987_v6 = vmul.f32 %v2539_v52, %v2027_v23  ;;  %v860_v29 = vmul.f32 %v2467_v5, %v2022_v61  ;;  %v665_v16 = vmul.f32 %v2458_v51, %v2010_v54 }
  0xf8   : > { %v955_v50 = vadd.f32 %v923_v44, %v891_v45  ;;  %v792_v31 = vadd.f32 %v760_v1, %v728_v26  ;;  %v1277_v46 = vadd.f32 %v2081_v35, %v1245_v20  ;;  %v1087_v9 = vmul.f32 %v2465_v57, %v2029_v25  ;;  %v2612_v26 = vld [vmem:[#allocation3 + $0x10a] sm:$0xff] }
  0xf9   : > { %v1182_v43 = vadd.f32 %v1150_v47, %v1118_v60  ;;  %v697_v14 = vmul.f32 %v2510_v12, %v2012_v55  ;;  %v1151_v5 = vmul.f32 %v2508_v48, %v2016_v58  ;;  %v924_v49 = vmul.f32 %v2517_v21, %v2025_v10  ;;  %v2616_v60 = vld [vmem:[#allocation3 + $0x120] sm:$0xff] }
  0xfa   : > { %v1019_v28 = vadd.f32 %v987_v6, %v955_v50  ;;  %v892_v41 = vadd.f32 %v860_v29, %v792_v31  ;;  %1309 = vst [vmem:[%s2096_s24 + $0xb0] sm:$0xff] %v1277_v46  ;;  %v1215_v3 = vmul.f32 %v2554_v40, %v2560_v22  ;;  %v761_v57 = vmul.f32 %v2564_v18, %v2014_v56  ;;  %v2623_v6 = vld [vmem:[%s2976_s2] ss:$0 sm:$0xff] }
  0xfb   : > { %v1246_v51 = vadd.f32 %v1214_v34, %v1182_v43  ;;  %v729_v33 = vadd.f32 %v697_v14, %v665_v16  ;;  %v988_v59 = vmul.f32 %v2571_v0, %v2027_v23  ;;  %v861_v30 = vmul.f32 %v2494_v63, %v2022_v61  ;;  %v2628_v16 = vld [vmem:[#allocation3 + $0x111] sm:$0xff] }
  0xfc   : > { %v1119_v62 = vadd.f32 %v1087_v9, %v1019_v28  ;;  %v956_v53 = vadd.f32 %v924_v49, %v892_v41  ;;  %v666_v32 = vmul.f32 %v2483_v15, %v2010_v54  ;;  %v698_v17 = vmul.f32 %v2534_v36, %v2012_v55 }
  0xfd   : > { %v1278_v37 = vadd.f32 %v2081_v35, %v1246_v51  ;;  %v793_v42 = vadd.f32 %v761_v57, %v729_v33  ;;  %v1088_v63 = vmul.f32 %v2486_v11, %v2029_v25  ;;  %v1152_v4 = vmul.f32 %v2537_v8, %v2016_v58  ;;  %v2645_v33 = vld [vmem:[#allocation3 + $0x128] sm:$0xff] }
  0xfe   : > { %v1183_v27 = vadd.f32 %v1151_v5, %v1119_v62  ;;  %v1020_v39 = vadd.f32 %v988_v59, %v956_v53  ;;  %v925_v7 = vmul.f32 %v2539_v52, %v2025_v10  ;;  %v730_v13 = vadd.f32 %v698_v17, %v666_v32  ;;  %v2648_v62 = vld [vmem:[#allocation3 + $0x112] sm:$0xff]  ;;  %v2650_v59 = vld [vmem:[#allocation3 + $0x121] sm:$0xff] }
  0xff   : > { %1310 = vst [vmem:[%s2096_s24 + $0xb8] sm:$0xff] %v1278_v37  ;;  %v893_v35 = vadd.f32 %v861_v30, %v793_v42  ;;  %v762_v15 = vmul.f32 %v2588_v24, %v2014_v56  ;;  %v1216_v45 = vmul.f32 %v2554_v40, %v2591_v19  ;;  %v989_v11 = vmul.f32 %v2593_v38, %v2027_v23 }
 0x100   : > { %v1247_v2 = vadd.f32 %v1215_v3, %v1183_v27  ;;  %v1120_v47 = vadd.f32 %v1088_v63, %v1020_v39  ;;  %v862_v20 = vmul.f32 %v2517_v21, %v2022_v61  ;;  %v667_v34 = vmul.f32 %v2510_v12, %v2010_v54 }
 0x101   : > { %v957_v44 = vadd.f32 %v925_v7, %v893_v35  ;;  %v794_v1 = vadd.f32 %v762_v15, %v730_v13  ;;  %v1089_v29 = vmul.f32 %v2508_v48, %v2029_v25  ;;  %v699_v21 = vmul.f32 %v2564_v18, %v2012_v55  ;;  %v2669_v15 = vld [vmem:[#allocation3 + $0x122] sm:$0xff] }
 0x102   : > { %v1279_v50 = vadd.f32 %v2623_v6, %v1247_v2  ;;  %v1184_v31 = vadd.f32 %v1152_v4, %v1120_v47  ;;  %v1153_v12 = vmul.f32 %v2560_v22, %v2016_v58  ;;  %v926_v9 = vmul.f32 %v2571_v0, %v2025_v10 }
 0x103   : > { %v1021_v46 = vadd.f32 %v989_v11, %v957_v44  ;;  %v894_v43 = vadd.f32 %v862_v20, %v794_v1  ;;  %v1217_v28 = vmul.f32 %v2554_v40, %v2612_v26  ;;  %v731_v5 = vadd.f32 %v699_v21, %v667_v34  ;;  %v2680_v34 = vld [vmem:[#allocation3 + $0x129] sm:$0xff] }
 0x104   : > { %1311 = vst [vmem:[%s2096_s24 + $0xc0] sm:$0xff] %v1279_v50  ;;  %v1248_v14 = vadd.f32 %v1216_v45, %v1184_v31  ;;  %v763_v48 = vmul.f32 %v2616_v60, %v2014_v56  ;;  %v990_v51 = vmul.f32 %v2628_v16, %v2027_v23  ;;  %v863_v3 = vmul.f32 %v2539_v52, %v2022_v61  ;;  %v2673_v45 = vld [vmem:[#allocation3 + $0x138] sm:$0xff] }
 0x105   : > { %v1121_v41 = vadd.f32 %v1089_v29, %v1021_v46  ;;  %v958_v49 = vadd.f32 %v926_v9, %v894_v43  ;;  %v668_v30 = vmul.f32 %v2534_v36, %v2010_v54  ;;  %v700_v37 = vmul.f32 %v2588_v24, %v2012_v55 }
 0x106   : > { %v1280_v57 = vadd.f32 %v2623_v6, %v1248_v14  ;;  %v795_v53 = vadd.f32 %v763_v48, %v731_v5  ;;  %v1090_v52 = vmul.f32 %v2537_v8, %v2029_v25  ;;  %v1154_v17 = vmul.f32 %v2591_v19, %v2016_v58  ;;  %v2697_v5 = vld [vmem:[#allocation3 + $0x140] sm:$0xff] }
 0x107   : > { %v1185_v42 = vadd.f32 %v1153_v12, %v1121_v41  ;;  %v1022_v32 = vadd.f32 %v990_v51, %v958_v49  ;;  %v927_v39 = vmul.f32 %v2593_v38, %v2025_v10  ;;  %v732_v63 = vadd.f32 %v700_v37, %v668_v30  ;;  %v2700_v41 = vld [vmem:[#allocation3 + $0x12a] sm:$0xff]  ;;  %v2702_v51 = vld [vmem:[#allocation3 + $0x139] sm:$0xff] }
 0x108   : > { %1312 = vst [vmem:[%s2096_s24 + $0xc8] sm:$0xff] %v1280_v57  ;;  %v895_v27 = vadd.f32 %v863_v3, %v795_v53  ;;  %v764_v36 = vmul.f32 %v2645_v33, %v2014_v56  ;;  %v1218_v7 = vmul.f32 %v2554_v40, %v2648_v62  ;;  %v991_v8 = vmul.f32 %v2650_v59, %v2027_v23 }
 0x109   : > { %v1249_v4 = vadd.f32 %v1217_v28, %v1185_v42  ;;  %v1122_v35 = vadd.f32 %v1090_v52, %v1022_v32  ;;  %v864_v47 = vmul.f32 %v2571_v0, %v2022_v61  ;;  %v669_v11 = vmul.f32 %v2564_v18, %v2010_v54 }
 0x10a   : > { %v959_v13 = vadd.f32 %v927_v39, %v895_v27  ;;  %v796_v2 = vadd.f32 %v764_v36, %v732_v63  ;;  %v1091_v20 = vmul.f32 %v2560_v22, %v2029_v25  ;;  %v701_v50 = vmul.f32 %v2616_v60, %v2012_v55  ;;  %v2721_v36 = vld [vmem:[#allocation3 + $0x13a] sm:$0xff] }
 0x10b   : > { %v1281_v44 = vadd.f32 %v2623_v6, %v1249_v4  ;;  %v1186_v1 = vadd.f32 %v1154_v17, %v1122_v35  ;;  %v1155_v0 = vmul.f32 %v2612_v26, %v2016_v58  ;;  %v928_v21 = vmul.f32 %v2628_v16, %v2025_v10 }
 0x10c   : > { %v1023_v31 = vadd.f32 %v991_v8, %v959_v13  ;;  %v896_v29 = vadd.f32 %v864_v47, %v796_v2  ;;  %v1219_v46 = vmul.f32 %v2554_v40, %v2669_v15  ;;  %v733_v12 = vadd.f32 %v701_v50, %v669_v11  ;;  %v2732_v11 = vld [vmem:[#allocation3 + $0x141] sm:$0xff] }
 0x10d   : > { %1313 = vst [vmem:[%s2096_s24 + $0xd0] sm:$0xff] %v1281_v44  ;;  %v1250_v18 = vadd.f32 %v1218_v7, %v1186_v1  ;;  %v765_v22 = vmul.f32 %v2673_v45, %v2014_v56  ;;  %v992_v14 = vmul.f32 %v2680_v34, %v2027_v23  ;;  %v865_v28 = vmul.f32 %v2593_v38, %v2022_v61  ;;  %v2725_v7 = vld [vmem:[#allocation3 + $0x150] sm:$0xff] }
 0x10e   : > { %v1123_v43 = vadd.f32 %v1091_v20, %v1023_v31  ;;  %v960_v9 = vadd.f32 %v928_v21, %v896_v29  ;;  %v670_v3 = vmul.f32 %v2588_v24, %v2010_v54  ;;  %v702_v57 = vmul.f32 %v2645_v33, %v2012_v55 }
 0x10f   : > { %v1282_v48 = vadd.f32 %v2623_v6, %v1250_v18  ;;  %v797_v49 = vadd.f32 %v765_v22, %v733_v12  ;;  %v1092_v38 = vmul.f32 %v2591_v19, %v2029_v25  ;;  %v1156_v37 = vmul.f32 %v2648_v62, %v2016_v58  ;;  %v2749_v12 = vld [vmem:[#allocation3 + $0x158] sm:$0xff] }
 0x110   : > { %v1187_v53 = vadd.f32 %v1155_v0, %v1123_v43  ;;  %v1024_v30 = vadd.f32 %v992_v14, %v960_v9  ;;  %v929_v32 = vmul.f32 %v2650_v59, %v2025_v10  ;;  %v734_v52 = vadd.f32 %v702_v57, %v670_v3  ;;  %v2752_v43 = vld [vmem:[#allocation3 + $0x142] sm:$0xff]  ;;  %v2754_v14 = vld [vmem:[#allocation3 + $0x151] sm:$0xff] }
 0x111   : > { %1314 = vst [vmem:[%s2096_s24 + $0xd8] sm:$0xff] %v1282_v48  ;;  %v897_v42 = vadd.f32 %v865_v28, %v797_v49  ;;  %v766_v24 = vmul.f32 %v2697_v5, %v2014_v56  ;;  %v1220_v39 = vmul.f32 %v2554_v40, %v2700_v41  ;;  %v993_v19 = vmul.f32 %v2702_v51, %v2027_v23 }
 0x112   : > { %v1251_v17 = vadd.f32 %v1219_v46, %v1187_v53  ;;  %v1124_v27 = vadd.f32 %v1092_v38, %v1024_v30  ;;  %v866_v35 = vmul.f32 %v2628_v16, %v2022_v61  ;;  %v671_v8 = vmul.f32 %v2616_v60, %v2010_v54 }
 0x113   : > { %v961_v63 = vadd.f32 %v929_v32, %v897_v42  ;;  %v798_v4 = vadd.f32 %v766_v24, %v734_v52  ;;  %v1093_v47 = vmul.f32 %v2612_v26, %v2029_v25  ;;  %v703_v44 = vmul.f32 %v2673_v45, %v2012_v55  ;;  %v2773_v24 = vld [vmem:[#allocation3 + $0x152] sm:$0xff] }
 0x114   : > { %v1283_v13 = vadd.f32 %v2623_v6, %v1251_v17  ;;  %v1188_v2 = vadd.f32 %v1156_v37, %v1124_v27  ;;  %v1157_v16 = vmul.f32 %v2669_v15, %v2016_v58  ;;  %v930_v50 = vmul.f32 %v2680_v34, %v2025_v10 }
 0x115   : > { %v1025_v1 = vadd.f32 %v993_v19, %v961_v63  ;;  %v898_v20 = vadd.f32 %v866_v35, %v798_v4  ;;  %v1221_v31 = vmul.f32 %v2554_v40, %v2721_v36  ;;  %v735_v0 = vadd.f32 %v703_v44, %v671_v8  ;;  %v2784_v8 = vld [vmem:[#allocation3 + $0x159] sm:$0xff] }
 0x116   : > { %1315 = vst [vmem:[%s2096_s24 + $0xe0] sm:$0xff] %v1283_v13  ;;  %v1252_v60 = vadd.f32 %v1220_v39, %v1188_v2  ;;  %v767_v26 = vmul.f32 %v2725_v7, %v2014_v56  ;;  %v994_v18 = vmul.f32 %v2732_v11, %v2027_v23  ;;  %v867_v46 = vmul.f32 %v2650_v59, %v2022_v61  ;;  %v2777_v39 = vld [vmem:[#allocation3 + $0x168] sm:$0xff] }
 0x117   : > { %v1125_v29 = vadd.f32 %v1093_v47, %v1025_v1  ;;  %v962_v21 = vadd.f32 %v930_v50, %v898_v20  ;;  %v672_v28 = vmul.f32 %v2645_v33, %v2010_v54  ;;  %v704_v48 = vmul.f32 %v2697_v5, %v2012_v55 }
 0x118   : > { %v1284_v22 = vadd.f32 %v2623_v6, %v1252_v60  ;;  %v799_v9 = vadd.f32 %v767_v26, %v735_v0  ;;  %v1094_v59 = vmul.f32 %v2648_v62, %v2029_v25  ;;  %v1158_v57 = vmul.f32 %v2700_v41, %v2016_v58  ;;  %v2801_v0 = vld [vmem:[#allocation3 + $0x170] sm:$0xff] }
 0x119   : > { %v1189_v49 = vadd.f32 %v1157_v16, %v1125_v29  ;;  %v1026_v3 = vadd.f32 %v994_v18, %v962_v21  ;;  %v931_v30 = vmul.f32 %v2702_v51, %v2025_v10  ;;  %v736_v38 = vadd.f32 %v704_v48, %v672_v28  ;;  %v2804_v29 = vld [vmem:[#allocation3 + $0x15a] sm:$0xff]  ;;  %v2806_v18 = vld [vmem:[#allocation3 + $0x169] sm:$0xff] }
 0x11a   : > { %1316 = vst [vmem:[%s2096_s24 + $0xe8] sm:$0xff] %v1284_v22  ;;  %v899_v53 = vadd.f32 %v867_v46, %v799_v9  ;;  %v768_v33 = vmul.f32 %v2749_v12, %v2014_v56  ;;  %v1222_v32 = vmul.f32 %v2554_v40, %v2752_v43  ;;  %v995_v62 = vmul.f32 %v2754_v14, %v2027_v23 }
 0x11b   : > { %v1253_v37 = vadd.f32 %v1221_v31, %v1189_v49  ;;  %v1126_v42 = vadd.f32 %v1094_v59, %v1026_v3  ;;  %v868_v27 = vmul.f32 %v2680_v34, %v2022_v61  ;;  %v673_v19 = vmul.f32 %v2673_v45, %v2010_v54 }
 0x11c   : > { %v963_v52 = vadd.f32 %v931_v30, %v899_v53  ;;  %v800_v17 = vadd.f32 %v768_v33, %v736_v38  ;;  %v1095_v35 = vmul.f32 %v2669_v15, %v2029_v25  ;;  %v705_v13 = vmul.f32 %v2725_v7, %v2012_v55  ;;  %v2825_v33 = vld [vmem:[#allocation3 + $0x16a] sm:$0xff] }
 0x11d   : > { %v1285_v63 = vadd.f32 %v2623_v6, %v1253_v37  ;;  %v1190_v4 = vadd.f32 %v1158_v57, %v1126_v42  ;;  %v1159_v34 = vmul.f32 %v2721_v36, %v2016_v58  ;;  %v932_v44 = vmul.f32 %v2732_v11, %v2025_v10 }
 0x11e   : > { %v1027_v2 = vadd.f32 %v995_v62, %v963_v52  ;;  %v900_v47 = vadd.f32 %v868_v27, %v800_v17  ;;  %v1223_v1 = vmul.f32 %v2554_v40, %v2773_v24  ;;  %v737_v16 = vadd.f32 %v705_v13, %v673_v19  ;;  %v2834_v19 = vld [vmem:[#allocation3 + $0x171] sm:$0xff] }
 0x11f   : > { %1317 = vst [vmem:[%s2096_s24 + $0xf0] sm:$0xff] %v1285_v63  ;;  %v1254_v45 = vadd.f32 %v1222_v32, %v1190_v4  ;;  %v769_v15 = vmul.f32 %v2777_v39, %v2014_v56  ;;  %v996_v60 = vmul.f32 %v2784_v8, %v2027_v23  ;;  %v869_v31 = vmul.f32 %v2702_v51, %v2022_v61  ;;  %v643_v32 = vld [vmem:[#allocation3 + $0x180] sm:$0xff] }
 0x120   : > { %v1127_v20 = vadd.f32 %v1095_v35, %v1027_v2  ;;  %v964_v50 = vadd.f32 %v932_v44, %v900_v47  ;;  %v674_v46 = vmul.f32 %v2697_v5, %v2010_v54  ;;  %v706_v22 = vmul.f32 %v2749_v12, %v2012_v55 }
 0x121   : > { %v1286_v26 = vadd.f32 %v2623_v6, %v1254_v45  ;;  %v801_v21 = vadd.f32 %v769_v15, %v737_v16  ;;  %v1096_v51 = vmul.f32 %v2700_v41, %v2029_v25  ;;  %v1160_v48 = vmul.f32 %v2752_v43, %v2016_v58  ;;  %v644_v16 = vld [vmem:[#allocation3 + $0x188] sm:$0xff] }
 0x122   : > { %v1191_v9 = vadd.f32 %v1159_v34, %v1127_v20  ;;  %v1028_v28 = vadd.f32 %v996_v60, %v964_v50  ;;  %v933_v3 = vmul.f32 %v2754_v14, %v2025_v10  ;;  %v738_v59 = vadd.f32 %v706_v22, %v674_v46  ;;  %v2851_v20 = vld [vmem:[#allocation3 + $0x172] sm:$0xff]  ;;  %v839_v60 = vld [vmem:[#allocation3 + $0x181] sm:$0xff] }
 0x123   : > { %1318 = vst [vmem:[%s2096_s24 + $0xf8] sm:$0xff] %v1286_v26  ;;  %v901_v49 = vadd.f32 %v869_v31, %v801_v21  ;;  %v770_v5 = vmul.f32 %v2801_v0, %v2014_v56  ;;  %v1224_v30 = vmul.f32 %v2554_v40, %v2804_v29  ;;  %v997_v41 = vmul.f32 %v2806_v18, %v2027_v23 }
 0x124   : > { %v1255_v57 = vadd.f32 %v1223_v1, %v1191_v9  ;;  %v1128_v53 = vadd.f32 %v1096_v51, %v1028_v28  ;;  %v870_v42 = vmul.f32 %v2732_v11, %v2022_v61  ;;  %v675_v62 = vmul.f32 %v2725_v7, %v2010_v54 }
 0x125   : > { %v965_v38 = vadd.f32 %v933_v3, %v901_v49  ;;  %v802_v37 = vadd.f32 %v770_v5, %v738_v59  ;;  %v1097_v27 = vmul.f32 %v2721_v36, %v2029_v25  ;;  %v707_v63 = vmul.f32 %v2777_v39, %v2012_v55 }
 0x126   : > { %v1287_v52 = vadd.f32 %v2623_v6, %v1255_v57  ;;  %v1192_v17 = vadd.f32 %v1160_v48, %v1128_v53  ;;  %v1161_v35 = vmul.f32 %v2773_v24, %v2016_v58  ;;  %v934_v13 = vmul.f32 %v2784_v8, %v2025_v10 }
 0x127   : > { %v1029_v4 = vadd.f32 %v997_v41, %v965_v38  ;;  %v902_v11 = vadd.f32 %v870_v42, %v802_v37  ;;  %v1225_v2 = vmul.f32 %v2554_v40, %v2825_v33  ;;  %v739_v34 = vadd.f32 %v707_v63, %v675_v62  ;;  %v840_v38 = vld [vmem:[#allocation3 + $0x189] sm:$0xff]  ;;  %v1551_v42 = vld [vmem:[#allocation2] sm:$0xff] }
 0x128   : > { %1319 = vst [vmem:[%s2096_s24 + $0x100] sm:$0xff] %v1287_v52  ;;  %v1256_v7 = vadd.f32 %v1224_v30, %v1192_v17  ;;  %v771_v36 = vmul.f32 %v643_v32, %v2014_v56  ;;  %v998_v45 = vmul.f32 %v2834_v19, %v2027_v23  ;;  %v871_v1 = vmul.f32 %v2754_v14, %v2022_v61 }
 0x129   : > { %v1129_v47 = vadd.f32 %v1097_v27, %v1029_v4  ;;  %v966_v44 = vadd.f32 %v934_v13, %v902_v11  ;;  %v676_v31 = vmul.f32 %v2749_v12, %v2010_v54  ;;  %v708_v26 = vmul.f32 %v2801_v0, %v2012_v55  ;;  %v841_v13 = vld [vmem:[#allocation3 + $0x199] sm:$0xff] }
 0x12a   : > { %v1288_v15 = vadd.f32 %v2623_v6, %v1256_v7  ;;  %v803_v50 = vadd.f32 %v771_v36, %v739_v34  ;;  %v1098_v22 = vmul.f32 %v2752_v43, %v2029_v25  ;;  %v1162_v14 = vmul.f32 %v2804_v29, %v2016_v58 }
 0x12b   : > { %v1193_v21 = vadd.f32 %v1161_v35, %v1129_v47  ;;  %v1030_v46 = vadd.f32 %v998_v45, %v966_v44  ;;  %v935_v28 = vmul.f32 %v2806_v18, %v2025_v10  ;;  %v740_v51 = vadd.f32 %v708_v26, %v676_v31 }
 0x12c   : > { %1320 = vst [vmem:[%s2096_s24 + $0x108] sm:$0xff] %v1288_v15  ;;  %v903_v9 = vadd.f32 %v871_v1, %v803_v50  ;;  %v772_v48 = vmul.f32 %v644_v16, %v2014_v56  ;;  %v1226_v3 = vmul.f32 %v2554_v40, %v2851_v20  ;;  %v999_v59 = vmul.f32 %v839_v60, %v2027_v23  ;;  %v1068_v15 = vld [vmem:[#allocation3 + $0x18a] sm:$0xff] }
 0x12d   : > { %v1257_v12 = vadd.f32 %v1225_v2, %v1193_v21  ;;  %v1130_v49 = vadd.f32 %v1098_v22, %v1030_v46  ;;  %v872_v57 = vmul.f32 %v2784_v8, %v2022_v61  ;;  %v677_v53 = vmul.f32 %v2777_v39, %v2010_v54  ;;  %v1067_v39 = vld [vmem:[#allocation3 + $0x182] sm:$0xff] }
 0x12e   : > { %v967_v43 = vadd.f32 %v935_v28, %v903_v9  ;;  %v804_v5 = vadd.f32 %v772_v48, %v740_v51  ;;  %v709_v37 = vmul.f32 %v643_v32, %v2012_v55  ;;  %v773_v62 = vmul.f32 %v1551_v42, %v2014_v56 }
 0x12f   : > { %v1289_v30 = vadd.f32 %v2623_v6, %v1257_v12  ;;  %v1194_v41 = vadd.f32 %v1162_v14, %v1130_v49  ;;  %v1099_v17 = vmul.f32 %v2773_v24, %v2029_v25  ;;  %v936_v8 = vmul.f32 %v2834_v19, %v2025_v10 }
 0x130   : > { %v1031_v52 = vadd.f32 %v999_v59, %v967_v43  ;;  %v904_v27 = vadd.f32 %v872_v57, %v804_v5  ;;  %v1163_v4 = vmul.f32 %v2825_v33, %v2016_v58  ;;  %v741_v35 = vadd.f32 %v709_v37, %v677_v53 }
 0x131   : > { %1321 = vst [vmem:[%s2096_s24 + $0x110] sm:$0xff] %v1289_v30  ;;  %v1258_v63 = vadd.f32 %v1226_v3, %v1194_v41  ;;  %v1000_v56 = vmul.f32 %v840_v38, %v2027_v23  ;;  %v873_v24 = vmul.f32 %v2806_v18, %v2022_v61  ;;  %v678_v34 = vmul.f32 %v2801_v0, %v2010_v54  ;;  %v842_v0 = vld [vmem:[#allocation3 + $0x1a1] sm:$0xff] }
 0x132   : > { %v1131_v32 = vadd.f32 %v1099_v17, %v1031_v52  ;;  %v968_v11 = vadd.f32 %v936_v8, %v904_v27  ;;  %v805_v2 = vadd.f32 %v773_v62, %v741_v35  ;;  %v710_v36 = vmul.f32 %v644_v16, %v2012_v55  ;;  %v1069_v3 = vld [vmem:[#allocation3 + $0x19a] sm:$0xff] }
 0x133   : > { %v1290_v7 = vadd.f32 %v2623_v6, %v1258_v63  ;;  %v1227_v44 = vmul.f32 %v2554_v40, %v1067_v39  ;;  %v1100_v1 = vmul.f32 %v2804_v29, %v2029_v25  ;;  %v937_v18 = vmul.f32 %v839_v60, %v2025_v10 }
 0x134   : > { %v1195_v47 = vadd.f32 %v1163_v4, %v1131_v32  ;;  %v1032_v45 = vadd.f32 %v1000_v56, %v968_v11  ;;  %v905_v50 = vadd.f32 %v873_v24, %v805_v2  ;;  %v1001_v31 = vmul.f32 %v841_v13, %v2027_v23 }
 0x135   : > { %1322 = vst [vmem:[%s2096_s24 + $0x118] sm:$0xff] %v1290_v7  ;;  %v742_v26 = vadd.f32 %v710_v36, %v678_v34  ;;  %v1164_v55 = vmul.f32 %v2851_v20, %v2016_v58  ;;  %v874_v29 = vmul.f32 %v2834_v19, %v2022_v61  ;;  %v1228_v60 = vmul.f32 %v2554_v40, %v1068_v15 }
 0x136   : > { %v1259_v21 = vadd.f32 %v1227_v44, %v1195_v47  ;;  %v1132_v54 = vadd.f32 %v1100_v1, %v1032_v45  ;;  %v969_v16 = vadd.f32 %v937_v18, %v905_v50  ;;  %v1101_v9 = vmul.f32 %v2825_v33, %v2029_v25 }
 0x137   : > { %v806_v46 = vadd.f32 %v773_v62, %v742_v26  ;;  %v938_v48 = vmul.f32 %v840_v38, %v2025_v10  ;;  %v1002_v12 = vmul.f32 %v842_v0, %v2027_v23  ;;  %v1165_v19 = vmul.f32 %v1067_v39, %v2016_v58  ;;  %v1070_v23 = vld [vmem:[#allocation3 + $0x1a2] sm:$0xff] }
 0x138   : > { %v1291_v22 = vadd.f32 %v2623_v6, %v1259_v21  ;;  %v1196_v14 = vadd.f32 %v1164_v55, %v1132_v54  ;;  %v1033_v28 = vadd.f32 %v1001_v31, %v969_v16  ;;  %v1229_v5 = vmul.f32 %v2554_v40, %v1069_v3 }
 0x139   : > { %v906_v51 = vadd.f32 %v874_v29, %v806_v46  ;;  %v1102_v10 = vmul.f32 %v2851_v20, %v2029_v25  ;;  %v1166_v41 = vmul.f32 %v1068_v15, %v2016_v58  ;;  %v1230_v42 = vmul.f32 %v2554_v40, %v1070_v23 }
 0x13a   : > { %1323 = vst [vmem:[%s2096_s24 + $0x120] sm:$0xff] %v1291_v22  ;;  %v1260_v49 = vadd.f32 %v1228_v60, %v1196_v14  ;;  %v1133_v61 = vadd.f32 %v1101_v9, %v1033_v28 }
 0x13b   : > { %v970_v59 = vadd.f32 %v938_v48, %v906_v51 }
 0x13c   : > { %v1292_v43 = vadd.f32 %v2623_v6, %v1260_v49  ;;  %v1197_v33 = vadd.f32 %v1165_v19, %v1133_v61 }
 0x13d   : > { %v1034_v57 = vadd.f32 %v1002_v12, %v970_v59 }
 0x13e   : > { %1324 = vst [vmem:[%s2096_s24 + $0x128] sm:$0xff] %v1292_v43  ;;  %v1261_v53 = vadd.f32 %v1229_v5, %v1197_v33 }
 0x13f   : > { %v1134_v30 = vadd.f32 %v1102_v10, %v1034_v57 }
 0x140   : > { %v1293_v38 = vadd.f32 %v2623_v6, %v1261_v53 }
 0x141   : > { %v1198_v37 = vadd.f32 %v1166_v41, %v1134_v30 }
 0x142   : > { %1325 = vst [vmem:[%s2096_s24 + $0x130] sm:$0xff] %v1293_v38 }
 0x143   : > { %v1262_v62 = vadd.f32 %v1230_v42, %v1198_v37 }
 0x145   : > { %v1294_v25 = vadd.f32 %v2623_v6, %v1262_v62 }
 0x147   : > { %1326 = vst [vmem:[%s2096_s24 + $0x138] sm:$0xff] %v1294_v25 }
 0x148   : > { %1623 = shalt.err (!%p1620_p5)
}
 0x149   : > { %s1624_s6 = scalar_lea.hbm %s2921_s30, 5120  ;;  %s1628_s22 = scalar_lea.hbm %s2977_s3, 10240 }
 0x14a   : > { %p1625_p9 = scmp.ne.s32.totalorder %s2921_s30, %s1624_s6  ;;  %p1629_p3 = scmp.lt.u32.totalorder %s2921_s30, %s2977_s3 }
 0x14b   : > { %p1630_p7 = scmp.lt.u32.totalorder %s1628_s22, %s1624_s6  ;;  %p1632_p4 = scmp.lt.u32.totalorder %s1624_s6, %s2921_s30 }
 0x14c   : > { %p1626_p1 = pnand %p1625_p9, %p1821_p10 }
 0x14d   : > { %p1631_p11 = por %p1630_p7, %p1629_p3 }
 0x14e   : > { %p1627_p2 = pneg %p1626_p1 }
 0x14f   : > { %p1633_p6 = por %p1632_p4, %p1631_p11 }
 0x151   : > { %p1634_p8 = pnand %p1633_p6, %p1627_p2 }
 0x153   : > { %1637 = shalt.err (!%p1634_p8)
}
 0x154   : > { %s1704_s11 = smov 128   ;;  %s1705_s7 = smov 8  }
 0x155   : > { %1475 = dma.vmem_to_hbm [thread:$0]  (%p1821_p10), %s2924_s18, 5120, %s2921_s30, %s1328_s15, %s1704_s11, %s1704_s11, %s1705_s7  }
 0x156 PF: > { %s1357_s19 = sand.u32 1, %s1676_s12   ;;  %p2998_p12 = scmp.ne.s32.totalorder %s2987_s23, 0 }
 0x157   : > { %p2999_p13 = scmp.ge.s32.totalorder %s1696_s17, 2  ;;  %s1358_s9 = scalar_lea.sflag [#allocation6], %s1357_s19 }
 0x159   : > { %p1486_p0 = pnand %p2999_p13, %p2998_p12 }
 0x15b   : > { %1671 = dma.done.wait (!%p1486_p0), %s1358_s9, 5120  }
 0x15c   : > { %1673 = vsyncadd (!%p1486_p0), %s1358_s9, 4294962176  ;;  %s20_s17 = sadd.s32 1, %s1696_s17   ;;  %s3000_s12 = smov %s1680_s13 }
 0x15d   : > { %p17_p5 = scmp.ge.s32.totalorder %s20_s17, 4   ;;  %s3001_s13 = smov %s1684_s14 }
 0x15e   : > { %s3002_s14 = smov %s1830_s5  ;;  %s3003_s15 = smov %s1692_s16 }
 0x15f   : > { %s3004_s16 = smov %s3006_s28  ;;  %19 = sbr.rel (!%p17_p5) target bundleno = 7 (0x7), region = 89 }
 0x166   :  { %1363 = vsyncpa [#allocation5], 1 }
 0x167   :  { %1365 = vsyncpa [#allocation5 + $0x1], 1 }
 0x168   :  { %1366 = vsyncpa [#allocation8], 1 }
 0x169   :  { %1367 = vsyncpa [#allocation6], 1 }
 0x16a   :  { %1369 = vsyncpa [#allocation6 + $0x1], 1 }

</bundles_post_ra>
